<compile_context>
chip_gen: v7x
topology: tpu7x:2x2x1
jax: 0.10.0
libtpu: 0.0.40
codegen_flags: <defaults>
</compile_context>

<pallas_src>
import numpy as np
import jax
import jax.numpy as jnp
from jax.experimental import pallas as pl
from jax.experimental.pallas import tpu as pltpu


# ---------------------------------------------------------------------------
# Host-side helpers: PyTorch AdaptiveMaxPool2d window arithmetic + the exact
# 0/1 constants the kernel uses (a per-source-row window-size mask and a
# gather matrix that crops pole rows and compacts even columns).
# ---------------------------------------------------------------------------
def _adaptive_windows(out_size: int, in_size: int):
    starts = [(i * in_size) // out_size for i in range(out_size)]
    ends = [-((-(i + 1) * in_size) // out_size) for i in range(out_size)]  # ceil
    return starts, ends


def _build_pool_constants(BL: int):
    """Constants for one fused MCDown layer operating on lane-dense (C, Hi*Wi).

    Input (2*BL, 2*BL) -> AdaptiveMaxPool2d((BL+2, BL)) -> keep pooled rows 1..BL.

    Returns:
      mask: (1, Hi*Wi) float32; 1.0 on source rows whose pooled window spans 3
            rows, 0.0 otherwise (only positions selected by `sel` matter).
      sel : (Hi*Wi, BL*BL) float32 0/1 gather matrix;
            sel[hs[k+1]*Wi + 2j, k*BL + j] = 1.
    """
    Hi = Wi = 2 * BL
    Ho, Wo = BL + 2, BL

    # Width windows are exactly [2j, 2j+2): pairwise max, keep even columns.
    ws, we = _adaptive_windows(Wo, Wi)
    assert all(ws[j] == 2 * j and we[j] == 2 * j + 2 for j in range(Wo))

    # Height windows have size 2 or 3 (2B -> B+2); keep pooled rows 1..BL.
    hs, he = _adaptive_windows(Ho, Hi)
    mask = np.zeros((1, Hi * Wi), dtype=np.float32)
    sel = np.zeros((Hi * Wi, BL * BL), dtype=np.float32)
    for k in range(BL):
        i = k + 1                               # pooled row (pole rows 0, BL+1 dropped)
        size = he[i] - hs[i]
        assert size in (2, 3), size
        # No-wrap invariant for the in-kernel circular lane rolls: every row the
        # kept windows touch stays inside the channel's own image.
        assert hs[i] + size - 1 <= Hi - 1, (hs[i], size, Hi)
        if size == 3:
            mask[0, hs[i] * Wi:(hs[i] + 1) * Wi] = 1.0
        for j in range(BL):
            sel[hs[i] * Wi + 2 * j, k * BL + j] = 1.0
    return mask, sel


# ---------------------------------------------------------------------------
# The single fused kernel: layer-0 stand-in block + all MCDown stages, one grid
# step per batch element, every layer output stored once as a lane-dense slab.
# ---------------------------------------------------------------------------
def _make_fused_kernel(geom):
    """geom: list of dicts (one per MCDown layer) with static 'wi' (= hi) sizes."""
    n_down = len(geom)

    def kernel(*refs):
        pos = 0
        x_ref = refs[pos]; pos += 1
        w0_ref = refs[pos]; pos += 1
        b0_ref = refs[pos]; pos += 1
        layer_refs = []
        for _ in range(n_down):
            layer_refs.append(refs[pos:pos + 4])   # (mask, sel, w, b)
            pos += 4
        out_refs = refs[pos:]

        # ---- layers[0]: stand-in MCResNetBlock = pointwise channel mix ----------
        # (C0, C0) x (C0, H0*W0) MXU matmul, lane-dense N, single slab store.
        h = (jnp.dot(w0_ref[...], x_ref[0], preferred_element_type=jnp.float32)
             + b0_ref[...])
        out_refs[0][0] = h.astype(out_refs[0].dtype)

        # ---- MCDown layers: adaptive max-pool + pole crop + channel mix ----------
        for l in range(n_down):
            mask_ref, sel_ref, w_ref, b_ref = layer_refs[l]
            wi = geom[l]["wi"]
            hw = geom[l]["hi"] * wi               # flattened lane length of h

            # shift-left by k lanes == circular roll by (hw - k); wrapped lanes are
            # never selected by `sel` (host-side asserts in _build_pool_constants).
            mw = jnp.maximum(h, pltpu.roll(h, shift=hw - 1, axis=1))        # 2-wide cols
            mh2 = jnp.maximum(mw, pltpu.roll(mw, shift=hw - wi, axis=1))    # rows {r,r+1}
            mh3 = jnp.maximum(mh2, pltpu.roll(mw, shift=hw - 2 * wi, axis=1))  # +row r+2
            m = jnp.where(mask_ref[...] > 0.5, mh3, mh2)   # per-source-row window size

            # crop pooled rows 1..BL + even-column compaction: one lane-dense matmul
            # against an exact 0/1 matrix -> (Cin, BL*BL).
            s = jnp.dot(m, sel_ref[...], preferred_element_type=jnp.float32)

            # stand-in MCResNetBlock: pointwise channel mix + bias, single slab store.
            h = (jnp.dot(w_ref[...], s, preferred_element_type=jnp.float32)
                 + b_ref[...])
            out_refs[l + 1][0] = h.astype(out_refs[l + 1].dtype)

    return kernel


def mcdownsample_forward(x, params):
    """MCDownsample forward.  x: (N, C, 2*B, 2*B) -> (h, hL), all in one pallas_call."""
    N, C0, H0, W0 = x.shape
    assert H0 == W0
    x_flat = x.reshape(N, C0, H0 * W0)             # free metadata reshape, lane-dense

    down = params[1:]
    n_down = len(down)

    in_specs = [
        pl.BlockSpec((1, C0, H0 * W0), lambda n: (n, 0, 0)),
        pl.BlockSpec(params[0]["w"].shape, lambda n: (0, 0)),
        pl.BlockSpec(params[0]["b"].shape, lambda n: (0, 0)),
    ]
    inputs = [x_flat, params[0]["w"], params[0]["b"]]
    out_shapes = [jax.ShapeDtypeStruct((N, C0, H0 * W0), x.dtype)]
    out_specs = [pl.BlockSpec((1, C0, H0 * W0), lambda n: (n, 0, 0))]
    spatial = [(C0, H0)]

    geom = []
    cin, hi = C0, H0
    for p in down:
        bl = hi // 2
        cout, w_cin = p["w"].shape
        assert w_cin == cin
        assert p["mask"].shape == (1, hi * hi)
        assert p["S"].shape == (hi * hi, bl * bl)
        geom.append({"hi": hi, "wi": hi})
        in_specs += [
            pl.BlockSpec(p["mask"].shape, lambda n: (0, 0)),   # grid-invariant consts:
            pl.BlockSpec(p["S"].shape, lambda n: (0, 0)),      # fetched once, resident
            pl.BlockSpec(p["w"].shape, lambda n: (0, 0)),
            pl.BlockSpec(p["b"].shape, lambda n: (0, 0)),
        ]
        inputs += [p["mask"], p["S"], p["w"], p["b"]]
        out_shapes.append(jax.ShapeDtypeStruct((N, cout, bl * bl), x.dtype))
        out_specs.append(pl.BlockSpec((1, cout, bl * bl), lambda n: (n, 0, 0)))
        spatial.append((cout, bl))
        cin, hi = cout, bl

    outs = pl.pallas_call(
        _make_fused_kernel(geom),
        out_shape=tuple(out_shapes),
        grid=(N,),                                  # batch only; feeds both v7x TCs
        in_specs=in_specs,
        out_specs=tuple(out_specs),
        compiler_params=pltpu.CompilerParams(
            dimension_semantics=("parallel",),
            vmem_limit_bytes=32 * 1024 * 1024,
        ),
    )(*inputs)

    outs_nchw = [o.reshape(N, c, s, s) for o, (c, s) in zip(outs, spatial)]
    h = outs_nchw[-1]
    hL = outs_nchw[:-1]
    return h, hL


# ---------------------------------------------------------------------------
# Parameter construction (matches the module's per-layer channel/bandlimit plan).
# ---------------------------------------------------------------------------
def init_params(key, channels, B, nLayers):
    assert B % 2 == 0
    assert 2 * B / 2 ** (nLayers - 1) >= 8 and 2 * B % 2 ** (nLayers - 1) == 0
    keys = jax.random.split(key, 2 * nLayers)
    params = []
    w0 = jax.random.normal(keys[0], (channels, channels), jnp.float32) / np.sqrt(channels)
    b0 = jax.random.normal(keys[1], (channels, 1), jnp.float32) * 0.1
    params.append({"w": w0, "b": b0})
    for l in range(nLayers - 1):
        factor = 2 ** l
        cin = channels * factor
        cout = channels * factor * 2
        BL = B // factor
        if l == nLayers - 2:
            cout //= 2
        w = jax.random.normal(keys[2 * l + 2], (cout, cin), jnp.float32) / np.sqrt(cin)
        b = jax.random.normal(keys[2 * l + 3], (cout, 1), jnp.float32) * 0.1
        mask, sel = _build_pool_constants(BL)
        params.append({"w": w, "b": b,
                       "mask": jnp.asarray(mask), "S": jnp.asarray(sel)})
    return params


# ---------------------------------------------------------------------------
# Plain numpy reference (exact PyTorch AdaptiveMaxPool2d semantics) for testing.
# ---------------------------------------------------------------------------
def _adaptive_max_pool2d_ref(x, out_hw):
    N, C, H, W = x.shape
    Ho, Wo = out_hw
    hs, he = _adaptive_windows(Ho, H)
    ws, we = _adaptive_windows(Wo, W)
    out = np.empty((N, C, Ho, Wo), dtype=x.dtype)
    for i in range(Ho):
        for j in range(Wo):
            out[:, :, i, j] = x[:, :, hs[i]:he[i], ws[j]:we[j]].max(axis=(2, 3))
    return out


def reference_forward(x, params):
    x = np.asarray(x, np.float64)
    w0 = np.asarray(params[0]["w"], np.float64)
    b0 = np.asarray(params[0]["b"], np.float64)[:, 0]
    h = np.einsum("oc,nchw->nohw", w0, x) + b0[None, :, None, None]
    hL = []
    for p in params[1:]:
        hL.append(h)
        BL = h.shape[2] // 2
        pooled = _adaptive_max_pool2d_ref(h, (BL + 2, BL))
        cropped = pooled[:, :, 1:BL + 1, :]
        w = np.asarray(p["w"], np.float64)
        b = np.asarray(p["b"], np.float64)[:, 0]
        h = np.einsum("oc,nchw->nohw", w, cropped) + b[None, :, None, None]
    return h, hL


if __name__ == "__main__":
    # Small shapes consistent with the module constraints:
    # channels=4, B=16, nLayers=3  (2*B / 2^(nLayers-1) = 8 >= 8), batch=2.
    channels, B, nLayers, batch = 4, 16, 3, 2

    key = jax.random.PRNGKey(0)
    kx, kp = jax.random.split(key)
    x = jax.random.normal(kx, (batch, channels, 2 * B, 2 * B), jnp.float32)
    params = init_params(kp, channels, B, nLayers)

    fwd = jax.jit(mcdownsample_forward)
    h, hL = fwd(x, params)
    jax.block_until_ready((h, hL))

    final_c = channels * 2 ** (nLayers - 2)
    final_s = 2 * B // 2 ** (nLayers - 1)
    assert h.shape == (batch, final_c, final_s, final_s), h.shape
    assert len(hL) == nLayers - 1

    # Verify against an independent float64 numpy reference (exact adaptive-pool
    # windows).  The kernel is exact 0/1 selection + small-K f32 MXU matmuls, so a
    # tight tolerance is used (100x tighter than before).
    h_ref, hL_ref = reference_forward(np.asarray(x), params)
    np.testing.assert_allclose(np.asarray(h), h_ref, rtol=1e-4, atol=1e-5)
    for a, r in zip(hL, hL_ref):
        np.testing.assert_allclose(np.asarray(a), r, rtol=1e-4, atol=1e-5)

    print("KERNEL_OK")
</pallas_src>

<mosaic_0001>
module attributes {stable_mosaic.version = 11 : i64} {
  func.func @kernel(%arg0: i32, %arg1: memref<1x4x1024xf32, #tpu.memory_space<vmem>>, %arg2: memref<4x4xf32, #tpu.memory_space<vmem>>, %arg3: memref<4x1xf32, #tpu.memory_space<vmem>>, %arg4: memref<1x1024xf32, #tpu.memory_space<vmem>>, %arg5: memref<1024x256xf32, #tpu.memory_space<vmem>>, %arg6: memref<8x4xf32, #tpu.memory_space<vmem>>, %arg7: memref<8x1xf32, #tpu.memory_space<vmem>>, %arg8: memref<1x256xf32, #tpu.memory_space<vmem>>, %arg9: memref<256x64xf32, #tpu.memory_space<vmem>>, %arg10: memref<8x8xf32, #tpu.memory_space<vmem>>, %arg11: memref<8x1xf32, #tpu.memory_space<vmem>>, %arg12: memref<1x4x1024xf32, #tpu.memory_space<vmem>>, %arg13: memref<1x8x256xf32, #tpu.memory_space<vmem>>, %arg14: memref<1x8x64xf32, #tpu.memory_space<vmem>>) attributes {dimension_semantics = [#tpu.dimension_semantics<parallel>], iteration_bounds = array<i64: 2>, scalar_prefetch = 0 : i64, scratch_operands = 0 : i64, tpu.core_type = #tpu.core_type<tc>, window_params = [{transform_indices = @transform_0, window_bounds = array<i64: 1, 4, 1024>}, {pipeline_mode = #tpu.pipeline_mode<synchronous>, transform_indices = @transform_1, window_bounds = array<i64: 4, 4>}, {pipeline_mode = #tpu.pipeline_mode<synchronous>, transform_indices = @transform_2, window_bounds = array<i64: 4, 1>}, {pipeline_mode = #tpu.pipeline_mode<synchronous>, transform_indices = @transform_3, window_bounds = array<i64: 1, 1024>}, {pipeline_mode = #tpu.pipeline_mode<synchronous>, transform_indices = @transform_4, window_bounds = array<i64: 1024, 256>}, {pipeline_mode = #tpu.pipeline_mode<synchronous>, transform_indices = @transform_5, window_bounds = array<i64: 8, 4>}, {pipeline_mode = #tpu.pipeline_mode<synchronous>, transform_indices = @transform_6, window_bounds = array<i64: 8, 1>}, {pipeline_mode = #tpu.pipeline_mode<synchronous>, transform_indices = @transform_7, window_bounds = array<i64: 1, 256>}, {pipeline_mode = #tpu.pipeline_mode<synchronous>, transform_indices = @transform_8, window_bounds = array<i64: 256, 64>}, {pipeline_mode = #tpu.pipeline_mode<synchronous>, transform_indices = @transform_9, window_bounds = array<i64: 8, 8>}, {pipeline_mode = #tpu.pipeline_mode<synchronous>, transform_indices = @transform_10, window_bounds = array<i64: 8, 1>}, {transform_indices = @transform_11, window_bounds = array<i64: 1, 4, 1024>}, {transform_indices = @transform_12, window_bounds = array<i64: 1, 8, 256>}, {transform_indices = @transform_13, window_bounds = array<i64: 1, 8, 64>}]} {
    %c0 = arith.constant 0 : index
    %c0_0 = arith.constant 0 : index
    %0 = vector.load %arg2[%c0, %c0_0] : memref<4x4xf32, #tpu.memory_space<vmem>>, vector<4x4xf32>
    %c0_1 = arith.constant 0 : index
    %c0_2 = arith.constant 0 : index
    %c0_3 = arith.constant 0 : index
    %1 = vector.load %arg1[%c0_1, %c0_2, %c0_3] : memref<1x4x1024xf32, #tpu.memory_space<vmem>>, vector<1x4x1024xf32>
    %2 = vector.shape_cast %1 : vector<1x4x1024xf32> to vector<4x1024xf32>
    %cst = arith.constant dense<0.000000e+00> : vector<4x1024xf32>
    %3 = tpu.matmul %0, %2, %cst {dimension_numbers = #tpu.dot_dimension_numbers<[1], [0], [0], [1], [0, 0, 1, 1], [], []>} : vector<4x4xf32>, vector<4x1024xf32>, vector<4x1024xf32> -> vector<4x1024xf32>
    %c0_4 = arith.constant 0 : index
    %c0_5 = arith.constant 0 : index
    %4 = vector.load %arg3[%c0_4, %c0_5] : memref<4x1xf32, #tpu.memory_space<vmem>>, vector<4x1xf32>
    %5 = vector.broadcast %4 : vector<4x1xf32> to vector<4x1024xf32>
    %6 = arith.addf %3, %5 : vector<4x1024xf32>
    %c0_6 = arith.constant 0 : index
    %c0_7 = arith.constant 0 : index
    %c0_8 = arith.constant 0 : index
    %7 = vector.load %arg12[%c0_6, %c0_7, %c0_8] : memref<1x4x1024xf32, #tpu.memory_space<vmem>>, vector<1x4x1024xf32>
    %8 = vector.shape_cast %7 : vector<1x4x1024xf32> to vector<4x1024xf32>
    %9 = vector.shape_cast %6 : vector<4x1024xf32> to vector<1x4x1024xf32>
    tpu.vector_store %arg12[%c0_6, %c0_7, %c0_8], %9 {strides = array<i32>} : memref<1x4x1024xf32, #tpu.memory_space<vmem>>, vector<1x4x1024xf32>,
    %c1023_i32 = arith.constant 1023 : i32
    %10 = tpu.dynamic_rotate %6 by %c1023_i32 dim 1 : vector<4x1024xf32>, i32 -> vector<4x1024xf32>
    %11 = arith.maximumf %6, %10 : vector<4x1024xf32>
    %c992_i32 = arith.constant 992 : i32
    %12 = tpu.dynamic_rotate %11 by %c992_i32 dim 1 : vector<4x1024xf32>, i32 -> vector<4x1024xf32>
    %13 = arith.maximumf %11, %12 : vector<4x1024xf32>
    %c960_i32 = arith.constant 960 : i32
    %14 = tpu.dynamic_rotate %11 by %c960_i32 dim 1 : vector<4x1024xf32>, i32 -> vector<4x1024xf32>
    %15 = arith.maximumf %13, %14 : vector<4x1024xf32>
    %c0_9 = arith.constant 0 : index
    %c0_10 = arith.constant 0 : index
    %16 = vector.load %arg4[%c0_9, %c0_10] : memref<1x1024xf32, #tpu.memory_space<vmem>>, vector<1x1024xf32>
    %cst_11 = arith.constant 5.000000e-01 : f32
    %17 = vector.broadcast %cst_11 : f32 to vector<1x1024xf32>
    %18 = arith.cmpf ogt, %16, %17 : vector<1x1024xf32>
    %19 = vector.shape_cast %18 : vector<1x1024xi1> to vector<1x1024xi1>
    %20 = vector.broadcast %19 : vector<1x1024xi1> to vector<4x1024xi1>
    %21 = arith.select %20, %15, %13 : vector<4x1024xi1>, vector<4x1024xf32>
    %c0_12 = arith.constant 0 : index
    %c0_13 = arith.constant 0 : index
    %22 = vector.load %arg5[%c0_12, %c0_13] : memref<1024x256xf32, #tpu.memory_space<vmem>>, vector<1024x256xf32>
    %cst_14 = arith.constant dense<0.000000e+00> : vector<4x256xf32>
    %23 = tpu.matmul %21, %22, %cst_14 {dimension_numbers = #tpu.dot_dimension_numbers<[1], [0], [0], [1], [0, 0, 1, 1], [], []>} : vector<4x1024xf32>, vector<1024x256xf32>, vector<4x256xf32> -> vector<4x256xf32>
    %c0_15 = arith.constant 0 : index
    %c0_16 = arith.constant 0 : index
    %24 = vector.load %arg6[%c0_15, %c0_16] : memref<8x4xf32, #tpu.memory_space<vmem>>, vector<8x4xf32>
    %cst_17 = arith.constant dense<0.000000e+00> : vector<8x256xf32>
    %25 = tpu.matmul %24, %23, %cst_17 {dimension_numbers = #tpu.dot_dimension_numbers<[1], [0], [0], [1], [0, 0, 1, 1], [], []>} : vector<8x4xf32>, vector<4x256xf32>, vector<8x256xf32> -> vector<8x256xf32>
    %c0_18 = arith.constant 0 : index
    %c0_19 = arith.constant 0 : index
    %26 = vector.load %arg7[%c0_18, %c0_19] : memref<8x1xf32, #tpu.memory_space<vmem>>, vector<8x1xf32>
    %27 = vector.broadcast %26 : vector<8x1xf32> to vector<8x256xf32>
    %28 = arith.addf %25, %27 : vector<8x256xf32>
    %c0_20 = arith.constant 0 : index
    %c0_21 = arith.constant 0 : index
    %c0_22 = arith.constant 0 : index
    %29 = vector.load %arg13[%c0_20, %c0_21, %c0_22] : memref<1x8x256xf32, #tpu.memory_space<vmem>>, vector<1x8x256xf32>
    %30 = vector.shape_cast %29 : vector<1x8x256xf32> to vector<8x256xf32>
    %31 = vector.shape_cast %28 : vector<8x256xf32> to vector<1x8x256xf32>
    tpu.vector_store %arg13[%c0_20, %c0_21, %c0_22], %31 {strides = array<i32>} : memref<1x8x256xf32, #tpu.memory_space<vmem>>, vector<1x8x256xf32>,
    %c255_i32 = arith.constant 255 : i32
    %32 = tpu.dynamic_rotate %28 by %c255_i32 dim 1 : vector<8x256xf32>, i32 -> vector<8x256xf32>
    %33 = arith.maximumf %28, %32 : vector<8x256xf32>
    %c240_i32 = arith.constant 240 : i32
    %34 = tpu.dynamic_rotate %33 by %c240_i32 dim 1 : vector<8x256xf32>, i32 -> vector<8x256xf32>
    %35 = arith.maximumf %33, %34 : vector<8x256xf32>
    %c224_i32 = arith.constant 224 : i32
    %36 = tpu.dynamic_rotate %33 by %c224_i32 dim 1 : vector<8x256xf32>, i32 -> vector<8x256xf32>
    %37 = arith.maximumf %35, %36 : vector<8x256xf32>
    %c0_23 = arith.constant 0 : index
    %c0_24 = arith.constant 0 : index
    %38 = vector.load %arg8[%c0_23, %c0_24] : memref<1x256xf32, #tpu.memory_space<vmem>>, vector<1x256xf32>
    %cst_25 = arith.constant 5.000000e-01 : f32
    %39 = vector.broadcast %cst_25 : f32 to vector<1x256xf32>
    %40 = arith.cmpf ogt, %38, %39 : vector<1x256xf32>
    %41 = vector.shape_cast %40 : vector<1x256xi1> to vector<1x256xi1>
    %42 = vector.broadcast %41 : vector<1x256xi1> to vector<8x256xi1>
    %43 = arith.select %42, %37, %35 : vector<8x256xi1>, vector<8x256xf32>
    %c0_26 = arith.constant 0 : index
    %c0_27 = arith.constant 0 : index
    %44 = vector.load %arg9[%c0_26, %c0_27] : memref<256x64xf32, #tpu.memory_space<vmem>>, vector<256x64xf32>
    %cst_28 = arith.constant dense<0.000000e+00> : vector<8x64xf32>
    %45 = tpu.matmul %43, %44, %cst_28 {dimension_numbers = #tpu.dot_dimension_numbers<[1], [0], [0], [1], [0, 0, 1, 1], [], []>} : vector<8x256xf32>, vector<256x64xf32>, vector<8x64xf32> -> vector<8x64xf32>
    %c0_29 = arith.constant 0 : index
    %c0_30 = arith.constant 0 : index
    %46 = vector.load %arg10[%c0_29, %c0_30] : memref<8x8xf32, #tpu.memory_space<vmem>>, vector<8x8xf32>
    %cst_31 = arith.constant dense<0.000000e+00> : vector<8x64xf32>
    %47 = tpu.matmul %46, %45, %cst_31 {dimension_numbers = #tpu.dot_dimension_numbers<[1], [0], [0], [1], [0, 0, 1, 1], [], []>} : vector<8x8xf32>, vector<8x64xf32>, vector<8x64xf32> -> vector<8x64xf32>
    %c0_32 = arith.constant 0 : index
    %c0_33 = arith.constant 0 : index
    %48 = vector.load %arg11[%c0_32, %c0_33] : memref<8x1xf32, #tpu.memory_space<vmem>>, vector<8x1xf32>
    %49 = vector.broadcast %48 : vector<8x1xf32> to vector<8x64xf32>
    %50 = arith.addf %47, %49 : vector<8x64xf32>
    %c0_34 = arith.constant 0 : index
    %c0_35 = arith.constant 0 : index
    %c0_36 = arith.constant 0 : index
    %51 = vector.load %arg14[%c0_34, %c0_35, %c0_36] : memref<1x8x64xf32, #tpu.memory_space<vmem>>, vector<1x8x64xf32>
    %52 = vector.shape_cast %51 : vector<1x8x64xf32> to vector<8x64xf32>
    %53 = vector.shape_cast %50 : vector<8x64xf32> to vector<1x8x64xf32>
    tpu.vector_store %arg14[%c0_34, %c0_35, %c0_36], %53 {strides = array<i32>} : memref<1x8x64xf32, #tpu.memory_space<vmem>>, vector<1x8x64xf32>,
    return
  }
  func.func @transform_0(%arg0: i32) -> (i32, i32, i32) {
    %c0_i32 = arith.constant 0 : i32
    %c0_i32_0 = arith.constant 0 : i32
    %c0_i32_1 = arith.constant 0 : i32
    return %arg0, %c0_i32, %c0_i32_0 : i32, i32, i32
  }
  func.func @transform_1(%arg0: i32) -> (i32, i32) {
    %c0_i32 = arith.constant 0 : i32
    %c0_i32_0 = arith.constant 0 : i32
    %c0_i32_1 = arith.constant 0 : i32
    return %c0_i32, %c0_i32_0 : i32, i32
  }
  func.func @transform_2(%arg0: i32) -> (i32, i32) {
    %c0_i32 = arith.constant 0 : i32
    %c0_i32_0 = arith.constant 0 : i32
    %c0_i32_1 = arith.constant 0 : i32
    return %c0_i32, %c0_i32_0 : i32, i32
  }
  func.func @transform_3(%arg0: i32) -> (i32, i32) {
    %c0_i32 = arith.constant 0 : i32
    %c0_i32_0 = arith.constant 0 : i32
    %c0_i32_1 = arith.constant 0 : i32
    return %c0_i32, %c0_i32_0 : i32, i32
  }
  func.func @transform_4(%arg0: i32) -> (i32, i32) {
    %c0_i32 = arith.constant 0 : i32
    %c0_i32_0 = arith.constant 0 : i32
    %c0_i32_1 = arith.constant 0 : i32
    return %c0_i32, %c0_i32_0 : i32, i32
  }
  func.func @transform_5(%arg0: i32) -> (i32, i32) {
    %c0_i32 = arith.constant 0 : i32
    %c0_i32_0 = arith.constant 0 : i32
    %c0_i32_1 = arith.constant 0 : i32
    return %c0_i32, %c0_i32_0 : i32, i32
  }
  func.func @transform_6(%arg0: i32) -> (i32, i32) {
    %c0_i32 = arith.constant 0 : i32
    %c0_i32_0 = arith.constant 0 : i32
    %c0_i32_1 = arith.constant 0 : i32
    return %c0_i32, %c0_i32_0 : i32, i32
  }
  func.func @transform_7(%arg0: i32) -> (i32, i32) {
    %c0_i32 = arith.constant 0 : i32
    %c0_i32_0 = arith.constant 0 : i32
    %c0_i32_1 = arith.constant 0 : i32
    return %c0_i32, %c0_i32_0 : i32, i32
  }
  func.func @transform_8(%arg0: i32) -> (i32, i32) {
    %c0_i32 = arith.constant 0 : i32
    %c0_i32_0 = arith.constant 0 : i32
    %c0_i32_1 = arith.constant 0 : i32
    return %c0_i32, %c0_i32_0 : i32, i32
  }
  func.func @transform_9(%arg0: i32) -> (i32, i32) {
    %c0_i32 = arith.constant 0 : i32
    %c0_i32_0 = arith.constant 0 : i32
    %c0_i32_1 = arith.constant 0 : i32
    return %c0_i32, %c0_i32_0 : i32, i32
  }
  func.func @transform_10(%arg0: i32) -> (i32, i32) {
    %c0_i32 = arith.constant 0 : i32
    %c0_i32_0 = arith.constant 0 : i32
    %c0_i32_1 = arith.constant 0 : i32
    return %c0_i32, %c0_i32_0 : i32, i32
  }
  func.func @transform_11(%arg0: i32) -> (i32, i32, i32) {
    %c0_i32 = arith.constant 0 : i32
    %c0_i32_0 = arith.constant 0 : i32
    %c0_i32_1 = arith.constant 0 : i32
    return %arg0, %c0_i32, %c0_i32_0 : i32, i32, i32
  }
  func.func @transform_12(%arg0: i32) -> (i32, i32, i32) {
    %c0_i32 = arith.constant 0 : i32
    %c0_i32_0 = arith.constant 0 : i32
    %c0_i32_1 = arith.constant 0 : i32
    return %arg0, %c0_i32, %c0_i32_0 : i32, i32, i32
  }
  func.func @transform_13(%arg0: i32) -> (i32, i32, i32) {
    %c0_i32 = arith.constant 0 : i32
    %c0_i32_0 = arith.constant 0 : i32
    %c0_i32_1 = arith.constant 0 : i32
    return %arg0, %c0_i32, %c0_i32_0 : i32, i32, i32
  }
}

</mosaic_0001>

<bundles_post_ra>
// kernel: mcdownsample_forward.1
= control target key start
LH: loop header
LB: loop body
LE: loop exit
PB: predicated region body
PF: predicated region fallthrough
CT: control target
= control target key end

     0   :  { %19 = vsyncpa [#allocation3], 0  ;;  %s2560_s25 = smov 0   ;;  %s3074_s0 = inlined_call_operand.vmem [shape: f32[2,4,1024], index: 0, kind: input, shape index: {}]   ;;  %s3075_s1 = inlined_call_operand.vmem [shape: f32[4,4], index: 1, kind: input, shape index: {}]   ;;  %s3076_s2 = inlined_call_operand.vmem [shape: f32[4,1], index: 2, kind: input, shape index: {}]   ;;  %s3077_s3 = inlined_call_operand.vmem [shape: f32[1,1024], index: 3, kind: input, shape index: {}]   ;;  %s3078_s4 = inlined_call_operand.hbm [shape: f32[1024,256], index: 4, kind: input, shape index: {}]   ;;  %s3079_s5 = inlined_call_operand.vmem [shape: f32[8,4], index: 5, kind: input, shape index: {}]   ;;  %s3080_s6 = inlined_call_operand.vmem [shape: f32[8,1], index: 6, kind: input, shape index: {}]   ;;  %s3081_s7 = inlined_call_operand.vmem [shape: f32[1,256], index: 7, kind: input, shape index: {}]   ;;  %s3082_s8 = inlined_call_operand.vmem [shape: f32[256,64], index: 8, kind: input, shape index: {}]   ;;  %s3083_s9 = inlined_call_operand.vmem [shape: f32[8,8], index: 9, kind: input, shape index: {}]   ;;  %s3084_s10 = inlined_call_operand.vmem [shape: f32[8,1], index: 10, kind: input, shape index: {}]   ;;  %s3085_s11 = inlined_call_operand.vmem [shape: f32[2,4,1024], index: 11, kind: output, shape index: {0}]   ;;  %s3086_s12 = inlined_call_operand.vmem [shape: f32[2,8,256], index: 12, kind: output, shape index: {1}]   ;;  %s3087_s13 = inlined_call_operand.vmem [shape: f32[2,8,64], index: 13, kind: output, shape index: {2}]  }
   0x1 LB: > { %s2566_s26 = sadd.s32 4294967295, %s2478_s25   ;;  %p1962_p0 = scmp.ge.s32.totalorder %s2478_s25, 1  ;;  %s2478_s25 = sphi %s2560_s25, %s25_s25  }
   0x2   : > { %p344_p1 = scmp.lt.s32.totalorder %s2478_s25, 3  ;;  %s2480_s27 = smov [#allocation2]  }
   0x3   : > { %s365_s28 = sshll.u32 %s2480_s27, 4  ;;  %p3088_p3 = scmp.eq.s32.totalorder %s2566_s26, 0  ;;  %s366_s28 = int_to_ptr.vmem [resolvable:$true] %s365_s28 }
   0x4   : > { %p2570_p2 = pnand %p1962_p0, %p344_p1  ;;  %s2440_s16 = scalar_lea.hbm %s3078_s4, 32768 }
   0x5   : > { %p2441_p6 = scmp.ne.s32.totalorder %s3078_s4, %s2440_s16  ;;  %p2447_p10 = scmp.lt.u32.totalorder %s2440_s16, %s3078_s4 }
   0x6   : > { %s3090_s29 = scalar_select %p2570_p2, 1, 0 }
   0x7   : > { %p2335_p4 = pneg %p2570_p2 }
   0x9   : > { %p2579_p5 = pnand %p3088_p3, %p2335_p4 }
   0xb   : > { %p2442_p7 = pneg %p2579_p5 }
   0xd   : > { %p2443_p8 = pnand %p2442_p7, %p2441_p6 }
   0xf   : > { %p2444_p9 = pneg %p2443_p8 }
  0x11   : > { %p2449_p11 = pnand %p2447_p10, %p2444_p9 }
  0x13   : > { %2452 = shalt.err (!%p2449_p11)
}
  0x14   : > { %s2453_s21 = scalar_lea.vmem %s366_s28, 32768  ;;  %p2461_p1 = scmp.lt.s32.totalorder %s366_s28, %s366_s28 }
  0x15   : > { %p2454_p12 = scmp.ne.s32.totalorder %s366_s28, %s2453_s21  ;;  %p2462_p4 = scmp.lt.s32.totalorder %s2453_s21, %s2453_s21 }
  0x17   : > { %p2456_p13 = pnand %p2454_p12, %p2442_p7  ;;  %p2463_p3 = por %p2462_p4, %p2461_p1 }
  0x19   : > { %p2457_p0 = pneg %p2456_p13 }
  0x1b   : > { %p2464_p2 = pnand %p2463_p3, %p2457_p0 }
  0x1d   : > { %2467 = shalt.err (!%p2464_p2)
}
  0x1e   : > { %s2481_s22 = smov 256   ;;  %s2482_s23 = smov 16  }
  0x1f   : > { %2338 = dma.hbm_to_vmem [thread:$0]  (!%p2579_p5), %s3078_s4, 32768, %s366_s28, [#allocation3], %s2481_s22, %s2481_s22, %s2482_s23  }
  0x20   : > { %p3092_p6 = scmp.ne.s32.totalorder %s3090_s29, 0 }
  0x21   : > { %p3093_p8 = scmp.eq.s32.totalorder (!%p3092_p6), %s2566_s26, 0 }
  0x22   : > { %407 = sbr.rel (%p3092_p6) target bundleno = 1705 (0x6a9), region = 64 }
  0x29   : > { %2473 = dma.done.wait (%p3093_p8), [#allocation3], 32768   ;;  %p3094_p7 = pmov %p3093_p8 }
  0x2a   : > { %p460_p2 = scmp.lt.s32.totalorder %s2566_s26, 1  ;;  %v2483_v0 = vmov 0.0   ;;  %v2484_v1 = vmov 0   ;;  %vm502_vm0 = vcmask 1043456   ;;  %v479_v7 = vld [vmem:[%s3075_s1] sm:$0xf] }
  0x2b   : > { %2475 = vsyncadd (%p3094_p7), [#allocation3], 4294934528  ;;  %583 = vmatprep.mubr.f32.mxu1 %v2483_v0  ;;  %2359 = vset.pattern.permute.xlu0 %v2484_v1  ;;  %vm498_vm1 = vcmask 31744   ;;  %v484_v8 = vld [vmem:[%s3076_s2] sm:$0xf]  ;;  %s2485_s22 = smov 127  }
  0x2c   : > { %s3096_s26 = smov (!%p460_p2, %s2566_s26), 1  ;;  %2420 = vset.pattern.permute.xlu1 %v2484_v1  ;;  %487 = vperm.xlu0 %2359, %v484_v8   ;;  %v976_v37 = vld [vmem:[#allocation2 + $0x8] sm:$0xff]  ;;  %v978_v38 = vld [vmem:[#allocation2 + $0x18] sm:$0xff]  ;;  %v975_v39 = vld [vmem:[#allocation2] sm:$0xff]  ;;  %s2486_s27 = smov 96  }
  0x2d   : > { %s1992_s28 = sshll.u32 %s3096_s26, 5  ;;  %v2037_v40 = vpack.c.bf16 %v978_v38, %v976_v37  ;;  %v977_v41 = vld [vmem:[#allocation2 + $0x10] sm:$0xff]  ;;  %v1104_v42 = vld [vmem:[#allocation2 + $0x408] sm:$0xff]  ;;  %v1106_v43 = vld [vmem:[#allocation2 + $0x418] sm:$0xff]  ;;  %s1994_s16 = sshll.u32 %s3096_s26, 4 }
  0x2e   : > { %s464_s14 = scalar_lea.vmem %s3074_s0, %s1992_s28  ;;  %s469_s21 = scalar_lea.vmem %s3085_s11, %s1992_s28  ;;  %v2039_v44 = vpack.c.bf16 %v977_v41, %v975_v39  ;;  %v2165_v45 = vpack.c.bf16 %v1106_v43, %v1104_v42  ;;  %v1103_v46 = vld [vmem:[#allocation2 + $0x400] sm:$0xff]  ;;  %v1105_v47 = vld [vmem:[#allocation2 + $0x410] sm:$0xff]  ;;  %v980_v48 = vld [vmem:[#allocation2 + $0x28] sm:$0xff] }
  0x2f   : > { %v480_v2 = vld [vmem:[%s464_s14] sm:$0xff]  ;;  %v481_v3 = vld [vmem:[%s464_s14 + $0x8] sm:$0xff]  ;;  %v482_v6 = vld [vmem:[%s464_s14 + $0x10] sm:$0xff]  ;;  %v2167_v49 = vpack.c.bf16 %v1105_v47, %v1103_v46  ;;  %s2487_s28 = smov 64   ;;  %s474_s19 = scalar_lea.vmem %s3086_s12, %s1994_s16 }
  0x30   : > { %v494_v4 = vcombine.high %v480_v2, %v480_v2  ;;  %v495_v5 = vcombine.high %v481_v3, %v481_v3  ;;  %v496_v9 = vcombine.high %v482_v6, %v482_v6  ;;  %v483_v10 = vld [vmem:[%s464_s14 + $0x18] sm:$0xff]  ;;  %v979_v51 = vld [vmem:[#allocation2 + $0x20] sm:$0xff]  ;;  %v981_v52 = vld [vmem:[#allocation2 + $0x30] sm:$0xff]  ;;  %2166 = vmatprep.subr.bf16.mxu0 %v2165_v45  ;;  %s2488_s15 = smov 112  }
  0x31   : > { %v497_v11 = vcombine.high %v483_v10, %v483_v10  ;;  %v982_v50 = vld [vmem:[#allocation2 + $0x38] sm:$0xff]  ;;  %v2043_v54 = vpack.c.bf16 %v981_v52, %v979_v51  ;;  %v1108_v55 = vld [vmem:[#allocation2 + $0x428] sm:$0xff]  ;;  %v1107_v57 = vld [vmem:[#allocation2 + $0x420] sm:$0xff]  ;;  %2168 = vmatpush1.bf16.msra.mxu0 %v2167_v49 }
  0x32   : > { %1974 = vmatprep.subr.msk.mxu1 %vm502_vm0, %v494_v4  ;;  %v2041_v53 = vpack.c.bf16 %v982_v50, %v980_v48  ;;  %v1110_v56 = vld [vmem:[#allocation2 + $0x438] sm:$0xff]  ;;  %v1109_v59 = vld [vmem:[#allocation2 + $0x430] sm:$0xff]  ;;  %v984_v60 = vld [vmem:[#allocation2 + $0x48] sm:$0xff] }
  0x33   : > { %1975 = vmatpush1.msk.msra.mxu1 %vm502_vm0, %v480_v2  ;;  %v2169_v58 = vpack.c.bf16 %v1110_v56, %v1108_v55  ;;  %v986_v61 = vld [vmem:[#allocation2 + $0x58] sm:$0xff]  ;;  %v2171_v62 = vpack.c.bf16 %v1109_v59, %v1107_v57  ;;  %v983_v2 = vld [vmem:[#allocation2 + $0x40] sm:$0xff]  ;;  %v1112_v4 = vld [vmem:[#allocation2 + $0x448] sm:$0xff] }
  0x34   : > { %1976 = vmatmul.mubr.msk.f32.vlgmr.msra.gmra.mrb[0].mxu1 %vm498_vm1, %v479_v7  ;;  %1977 = vmatprep.subr.msk.mxu1 %vm502_vm0, %v495_v5  ;;  %v2045_v63 = vpack.c.bf16 %v986_v61, %v984_v60  ;;  %v1114_v5 = vld [vmem:[#allocation2 + $0x458] sm:$0xff]  ;;  %v993_v37 = vld [vmem:[#allocation2 + $0x90] sm:$0xff]  ;;  %v1119_v38 = vld [vmem:[#allocation2 + $0x480] sm:$0xff] }
  0x35   : > { %1978 = vmatpush1.msk.msra.mxu1 %vm502_vm0, %v481_v3  ;;  %654 = vmatprep.mubr.f32.mxu1 %v2483_v0  ;;  %v985_v3 = vld [vmem:[#allocation2 + $0x50] sm:$0xff]  ;;  %v996_v41 = vld [vmem:[#allocation2 + $0xa8] sm:$0xff]  ;;  %v998_v42 = vld [vmem:[#allocation2 + $0xb8] sm:$0xff] }
  0x36   : > { %1980 = vmatprep.subr.msk.mxu1 %vm502_vm0, %v496_v9  ;;  %2170 = vmatprep.subr.bf16.mxu0 %v2169_v58  ;;  %v2047_v8 = vpack.c.bf16 %v985_v3, %v983_v2  ;;  %v2173_v9 = vpack.c.bf16 %v1114_v5, %v1112_v4  ;;  %v1124_v43 = vld [vmem:[#allocation2 + $0x4a8] sm:$0xff]  ;;  %v2057_v47 = vpack.c.bf16 %v998_v42, %v996_v41  ;;  %v995_v48 = vld [vmem:[#allocation2 + $0xa0] sm:$0xff]  ;;  %v997_v49 = vld [vmem:[#allocation2 + $0xb0] sm:$0xff] }
  0x37   : > { %2172 = vmatpush1.bf16.msra.mxu0 %v2171_v62  ;;  %v1123_v50 = vld [vmem:[#allocation2 + $0x4a0] sm:$0xff]  ;;  %v1125_v52 = vld [vmem:[#allocation2 + $0x4b0] sm:$0xff]  ;;  %v1128_v55 = vld [vmem:[#allocation2 + $0x4c8] sm:$0xff]  ;;  %v2059_v57 = vpack.c.bf16 %v997_v49, %v995_v48 }
  0x38   : > { %1979 = vmatmul.mubr.msk.f32.vlgmr.msra.gmra.mrb[2].mxu1 %vm498_vm1, %v479_v7  ;;  %2174 = vmatprep.subr.bf16.mxu0 %v2173_v9  ;;  %v1130_v56 = vld [vmem:[#allocation2 + $0x4d8] sm:$0xff]  ;;  %v2187_v58 = vpack.c.bf16 %v1125_v52, %v1123_v50  ;;  %v999_v60 = vld [vmem:[#allocation2 + $0xc0] sm:$0xff]  ;;  %v1001_v61 = vld [vmem:[#allocation2 + $0xd0] sm:$0xff] }
  0x39   : > { %1981 = vmatpush1.msk.msra.mxu1 %vm502_vm0, %v482_v6  ;;  %725 = vmatprep.mubr.f32.mxu1 %v2483_v0  ;;  %v1111_v6 = vld [vmem:[#allocation2 + $0x440] sm:$0xff]  ;;  %v1129_v2 = vld [vmem:[#allocation2 + $0x4d0] sm:$0xff]  ;;  %v1004_v3 = vld [vmem:[#allocation2 + $0xe8] sm:$0xff] }
  0x3a   : > { %1983 = vmatprep.subr.msk.mxu1 %vm502_vm0, %v497_v11  ;;  %v990_v11 = vld [vmem:[#allocation2 + $0x78] sm:$0xff]  ;;  %v1127_v62 = vld [vmem:[#allocation2 + $0x4c0] sm:$0xff]  ;;  %v1132_v5 = vld [vmem:[#allocation2 + $0x4e8] sm:$0xff] }
  0x3b   : > { %v1006_v4 = vld [vmem:[#allocation2 + $0xf8] sm:$0xff]  ;;  %v1011_v42 = vld [vmem:[#allocation2 + $0x120] sm:$0xff]  ;;  %v1144_v49 = vld [vmem:[#allocation2 + $0x548] sm:$0xff] }
  0x3c   : > { %1982 = vmatmul.mubr.msk.f32.vlgmr.msra.gmra.mrb[4].mxu1 %vm498_vm1, %v479_v7  ;;  %v2065_v9 = vpack.c.bf16 %v1006_v4, %v1004_v3  ;;  %v1018_v48 = vld [vmem:[#allocation2 + $0x158] sm:$0xff]  ;;  %v1019_v4 = vld [vmem:[#allocation2 + $0x160] sm:$0xff] }
  0x3d   : > { %1984 = vmatpush1.msk.msra.mxu1 %vm502_vm0, %v483_v10  ;;  %796 = vmatprep.mubr.f32.mxu1 %v2483_v0  ;;  %v988_v10 = vld [vmem:[#allocation2 + $0x68] sm:$0xff]  ;;  %v1146_v50 = vld [vmem:[#allocation2 + $0x558] sm:$0xff] }
  0x3e   : > { %2038 = vmatprep.subr.bf16.mxu1 %v2037_v40  ;;  %v1121_v40 = vld [vmem:[#allocation2 + $0x490] sm:$0xff] }
  0x3f   : > { %v2183_v46 = vpack.c.bf16 %v1121_v40, %v1119_v38  ;;  %v1142_v38 = vld [vmem:[#allocation2 + $0x538] sm:$0xff] }
  0x40   : > { %1985 = vmatmul.mubr.msk.f32.vlgmr.msra.gmra.mrb[6].mxu1 %vm498_vm1, %v479_v7  ;;  %v1113_v7 = vld [vmem:[#allocation2 + $0x450] sm:$0xff] }
  0x41   : > { %2040 = vmatpush1.bf16.msra.mxu1 %v2039_v44  ;;  %v1126_v44 = vld [vmem:[#allocation2 + $0x4b8] sm:$0xff] }
  0x42   : > { %2042 = vmatprep.subr.bf16.mxu1 %v2041_v53  ;;  %v2185_v51 = vpack.c.bf16 %v1126_v44, %v1124_v43  ;;  %v1000_v53 = vld [vmem:[#allocation2 + $0xc8] sm:$0xff]  ;;  %v1013_v43 = vld [vmem:[#allocation2 + $0x130] sm:$0xff]  ;;  %v1139_v44 = vld [vmem:[#allocation2 + $0x520] sm:$0xff] }
  0x45   : > { %2044 = vmatpush1.bf16.msra.mxu1 %v2043_v54  ;;  %v1002_v54 = vld [vmem:[#allocation2 + $0xd8] sm:$0xff] }
  0x46   : > { %2046 = vmatprep.subr.bf16.mxu1 %v2045_v63  ;;  %v2061_v59 = vpack.c.bf16 %v1002_v54, %v1000_v53  ;;  %v2189_v63 = vpack.c.bf16 %v1130_v56, %v1128_v55  ;;  %v1015_v54 = vld [vmem:[#allocation2 + $0x140] sm:$0xff]  ;;  %v1017_v55 = vld [vmem:[#allocation2 + $0x150] sm:$0xff] }
  0x47   : > { %v1143_v56 = vld [vmem:[#allocation2 + $0x540] sm:$0xff] }
  0x49   : > { %2048 = vmatpush1.bf16.msra.mxu1 %v2047_v8  ;;  %v2191_v8 = vpack.c.bf16 %v1129_v2, %v1127_v62  ;;  %v1150_v62 = vld [vmem:[#allocation2 + $0x578] sm:$0xff] }
  0xab   : > { %v488_v12 = vpop.permute.xlu0 %487 }
 0x107   : > { %v585_v13 = vpop.f32.mrb[0].mxu1 }
 0x108   : > { %v2639_v14 = vadd.f32 %v585_v13, %v488_v12  ;;  %v587_v15 = vpop.f32.mrb[1].mxu1  ;;  %v2175_v13 = vpack.c.bf16 %v1113_v7, %v1111_v6  ;;  %v1134_v6 = vld [vmem:[#allocation2 + $0x4f8] sm:$0xff]  ;;  %v2063_v7 = vpack.c.bf16 %v1001_v61, %v999_v60  ;;  %v1148_v61 = vld [vmem:[#allocation2 + $0x568] sm:$0xff] }
 0x109   : > { %v2641_v16 = vadd.f32 %v587_v15, %v488_v12  ;;  %v2049_v15 = vpack.c.bf16 %v990_v11, %v988_v10  ;;  %v1003_v10 = vld [vmem:[#allocation2 + $0xe0] sm:$0xff]  ;;  %v1005_v11 = vld [vmem:[#allocation2 + $0xf0] sm:$0xff]  ;;  %v1022_v60 = vld [vmem:[#allocation2 + $0x178] sm:$0xff] }
 0x10a   : > { %2176 = vmatpush1.bf16.msra.mxu0 %v2175_v13  ;;  %v2193_v13 = vpack.c.bf16 %v1134_v6, %v1132_v5  ;;  %v1021_v5 = vld [vmem:[#allocation2 + $0x170] sm:$0xff]  ;;  %v1147_v6 = vld [vmem:[#allocation2 + $0x560] sm:$0xff] }
 0x10b   : > { %v811_v17 = vcombine.low %v2639_v14, %v2641_v16  ;;  %v656_v18 = vpop.f32.mrb[2].mxu1  ;;  %2050 = vmatprep.subr.bf16.mxu1 %v2049_v15  ;;  %v1133_v15 = vld [vmem:[#allocation2 + $0x4f0] sm:$0xff] }
 0x10c   : > { %v2650_v19 = vadd.f32 %v656_v18, %v488_v12  ;;  %v658_v20 = vpop.f32.mrb[3].mxu1  ;;  %v1116_v18 = vld [vmem:[#allocation2 + $0x468] sm:$0xff] }
 0x10d   : > { %819 = vst [vmem:[%s469_s21] sm:$0xff] %v811_v17  ;;  %v2652_v21 = vadd.f32 %v658_v20, %v488_v12  ;;  %v989_v17 = vld [vmem:[#allocation2 + $0x70] sm:$0xff]  ;;  %v1118_v20 = vld [vmem:[#allocation2 + $0x478] sm:$0xff] }
 0x10e   : > { %v2360_v22 = vpack.i.bf16 %v2650_v19, %v2641_v16 }
 0x10f   : > { %v812_v23 = vcombine.low %v2650_v19, %v2652_v21  ;;  %v727_v24 = vpop.f32.mrb[4].mxu1 }
 0x110   : > { %v2658_v25 = vadd.f32 %v727_v24, %v488_v12  ;;  %v729_v26 = vpop.f32.mrb[5].mxu1  ;;  %2361 = vrot.lane.b32.xlu0 %v2360_v22, %s2485_s22  ;;  %v2177_v22 = vpack.c.bf16 %v1118_v20, %v1116_v18  ;;  %v1117_v24 = vld [vmem:[#allocation2 + $0x470] sm:$0xff]  ;;  %v1010_v18 = vld [vmem:[#allocation2 + $0x118] sm:$0xff]  ;;  %v1136_v20 = vld [vmem:[#allocation2 + $0x508] sm:$0xff] }
 0x111   : > { %820 = vst [vmem:[%s469_s21 + $0x8] sm:$0xff] %v812_v23  ;;  %v2661_v27 = vadd.f32 %v729_v26, %v488_v12  ;;  %v1115_v23 = vld [vmem:[#allocation2 + $0x460] sm:$0xff]  ;;  %v992_v26 = vld [vmem:[#allocation2 + $0x88] sm:$0xff] }
 0x112   : > { %v2375_v28 = vpack.i.bf16 %v2658_v25, %v2639_v14  ;;  %2178 = vmatprep.subr.bf16.mxu0 %v2177_v22  ;;  %v1138_v22 = vld [vmem:[#allocation2 + $0x518] sm:$0xff] }
 0x113   : > { %v813_v29 = vcombine.low %v2658_v25, %v2661_v27  ;;  %v798_v30 = vpop.f32.mrb[6].mxu1  ;;  %v2365_v31 = vpack.i.bf16 %v2661_v27, %v2652_v21 }
 0x114   : > { %v2669_v32 = vadd.f32 %v798_v30, %v488_v12  ;;  %v800_v33 = vpop.f32.mrb[7].mxu1  ;;  %2376 = vrot.lane.b32.xlu0 %v2375_v28, %s2485_s22  ;;  %v994_v28 = vld [vmem:[#allocation2 + $0x98] sm:$0xff]  ;;  %v1120_v30 = vld [vmem:[#allocation2 + $0x488] sm:$0xff] }
 0x115   : > { %821 = vst [vmem:[%s469_s21 + $0x10] sm:$0xff] %v813_v29  ;;  %v2672_v34 = vadd.f32 %v800_v33, %v488_v12  ;;  %2366 = vrot.lane.b32.xlu1 %v2365_v31, %s2485_s22  ;;  %v987_v12 = vld [vmem:[#allocation2 + $0x60] sm:$0xff]  ;;  %v1122_v31 = vld [vmem:[#allocation2 + $0x498] sm:$0xff]  ;;  %v2179_v33 = vpack.c.bf16 %v1117_v24, %v1115_v23  ;;  %v2067_v23 = vpack.c.bf16 %v1005_v11, %v1003_v10  ;;  %v1152_v11 = vld [vmem:[#allocation2 + $0x588] sm:$0xff] }
 0x116   : > { %v2051_v29 = vpack.c.bf16 %v989_v17, %v987_v12  ;;  %v2181_v39 = vpack.c.bf16 %v1122_v31, %v1120_v30  ;;  %v1131_v12 = vld [vmem:[#allocation2 + $0x4e0] sm:$0xff]  ;;  %v1008_v17 = vld [vmem:[#allocation2 + $0x108] sm:$0xff]  ;;  %v2197_v31 = vpack.c.bf16 %v1138_v22, %v1136_v20  ;;  %v1026_v10 = vld [vmem:[#allocation2 + $0x198] sm:$0xff] }
 0x117   : > { %v814_v35 = vcombine.low %v2669_v32, %v2672_v34  ;;  %v2370_v36 = vpack.i.bf16 %v2672_v34, %v2669_v32  ;;  %2180 = vmatpush1.bf16.msra.mxu0 %v2179_v33  ;;  %v2195_v24 = vpack.c.bf16 %v1133_v15, %v1131_v12  ;;  %v1135_v30 = vld [vmem:[#allocation2 + $0x500] sm:$0xff]  ;;  %v1137_v33 = vld [vmem:[#allocation2 + $0x510] sm:$0xff]  ;;  %v1154_v12 = vld [vmem:[#allocation2 + $0x598] sm:$0xff] }
 0x118   : > { %2052 = vmatpush1.bf16.msra.mxu1 %v2051_v29  ;;  %2182 = vmatprep.subr.bf16.mxu0 %v2181_v39  ;;  %v1009_v29 = vld [vmem:[#allocation2 + $0x110] sm:$0xff]  ;;  %v2199_v40 = vpack.c.bf16 %v1137_v33, %v1135_v30  ;;  %v2213_v22 = vpack.c.bf16 %v1154_v12, %v1152_v11  ;;  %v1028_v30 = vld [vmem:[#allocation2 + $0x1a8] sm:$0xff] }
 0x119   : > { %822 = vst [vmem:[%s469_s21 + $0x18] sm:$0xff] %v814_v35  ;;  %2371 = vrot.lane.b32.xlu1 %v2370_v36, %s2485_s22  ;;  %v2053_v35 = vpack.c.bf16 %v994_v28, %v992_v26  ;;  %v991_v36 = vld [vmem:[#allocation2 + $0x80] sm:$0xff]  ;;  %v2069_v26 = vpack.c.bf16 %v1010_v18, %v1008_v17  ;;  %v1025_v20 = vld [vmem:[#allocation2 + $0x190] sm:$0xff]  ;;  %s1973_s21 = sshll.u32 %s3096_s26, 3 }
 0x11a   : > { %v2055_v45 = vpack.c.bf16 %v993_v37, %v991_v36  ;;  %v1007_v28 = vld [vmem:[#allocation2 + $0x100] sm:$0xff]  ;;  %v1014_v36 = vld [vmem:[#allocation2 + $0x138] sm:$0xff]  ;;  %v1140_v37 = vld [vmem:[#allocation2 + $0x528] sm:$0xff] }
 0x11b   : > { %2054 = vmatprep.subr.bf16.mxu1 %v2053_v35  ;;  %2184 = vmatpush1.bf16.msra.mxu0 %v2183_v46  ;;  %v1012_v35 = vld [vmem:[#allocation2 + $0x128] sm:$0xff]  ;;  %v2071_v39 = vpack.c.bf16 %v1009_v29, %v1007_v28  ;;  %v1141_v46 = vld [vmem:[#allocation2 + $0x530] sm:$0xff]  ;;  %v1023_v18 = vld [vmem:[#allocation2 + $0x180] sm:$0xff]  ;;  %v839_v29 = vlaneseq }
 0x11c   : > { %2056 = vmatpush1.bf16.msra.mxu1 %v2055_v45  ;;  %2186 = vmatprep.subr.bf16.mxu0 %v2185_v51  ;;  %v2073_v41 = vpack.c.bf16 %v1014_v36, %v1012_v35  ;;  %v2201_v45 = vpack.c.bf16 %v1142_v38, %v1140_v37  ;;  %v2075_v51 = vpack.c.bf16 %v1013_v43, %v1011_v42  ;;  %v1027_v36 = vld [vmem:[#allocation2 + $0x1a0] sm:$0xff]  ;;  %v1029_v37 = vld [vmem:[#allocation2 + $0x1b0] sm:$0xff]  ;;  %v1156_v38 = vld [vmem:[#allocation2 + $0x5a8] sm:$0xff] }
 0x11d   : > { %2058 = vmatprep.subr.bf16.mxu1 %v2057_v47  ;;  %v1016_v47 = vld [vmem:[#allocation2 + $0x148] sm:$0xff]  ;;  %v2203_v52 = vpack.c.bf16 %v1141_v46, %v1139_v44  ;;  %v2681_v33 = vand.u32 127, %v839_v29  ;;  %v1155_v42 = vld [vmem:[#allocation2 + $0x5a0] sm:$0xff]  ;;  %v1157_v43 = vld [vmem:[#allocation2 + $0x5b0] sm:$0xff] }
 0x11e   : > { %v2077_v53 = vpack.c.bf16 %v1018_v48, %v1016_v47  ;;  %v2219_v47 = vpack.c.bf16 %v1157_v43, %v1155_v42  ;;  %v1032_v48 = vld [vmem:[#allocation2 + $0x1c8] sm:$0xff]  ;;  %v1170_v43 = vld [vmem:[#allocation2 + $0x618] sm:$0xff] }
 0x11f   : > { %2188 = vmatpush1.bf16.msra.mxu0 %v2187_v58  ;;  %v1145_v58 = vld [vmem:[#allocation2 + $0x550] sm:$0xff]  ;;  %vm841_vm2 = vcmp.lt.s32.totalorder %v2681_v33, 127  ;;  %v1168_v42 = vld [vmem:[#allocation2 + $0x608] sm:$0xff]  ;;  %vm874_vm4 = vcmp.lt.s32.totalorder %v2681_v33, 96  ;;  %vm907_vm5 = vcmp.lt.s32.totalorder %v2681_v33, 64  ;;  %vm1616_vm15 = vcmp.lt.s32.totalorder %v2681_v33, 112 }
 0x120   : > { %2060 = vmatpush1.bf16.msra.mxu1 %v2059_v57  ;;  %2190 = vmatprep.subr.bf16.mxu0 %v2189_v63  ;;  %v2205_v57 = vpack.c.bf16 %v1146_v50, %v1144_v49  ;;  %v2079_v63 = vpack.c.bf16 %v1017_v55, %v1015_v54  ;;  %v2207_v2 = vpack.c.bf16 %v1145_v58, %v1143_v56  ;;  %v1034_v49 = vld [vmem:[#allocation2 + $0x1d8] sm:$0xff]  ;;  %v1161_v58 = vld [vmem:[#allocation2 + $0x5d0] sm:$0xff]  ;;  %v1746_v33 = vld [vmem:[%s3083_s9] sm:$0xff] }
 0x121   : > { %2062 = vmatprep.subr.bf16.mxu1 %v2061_v59  ;;  %v1020_v59 = vld [vmem:[#allocation2 + $0x168] sm:$0xff]  ;;  %v2093_v50 = vpack.c.bf16 %v1034_v49, %v1032_v48  ;;  %v1162_v56 = vld [vmem:[#allocation2 + $0x5d8] sm:$0xff] }
 0x122   : > { %v2081_v3 = vpack.c.bf16 %v1022_v60, %v1020_v59 }
 0x123   : > { %2192 = vmatpush1.bf16.msra.mxu0 %v2191_v8  ;;  %v1149_v8 = vld [vmem:[#allocation2 + $0x570] sm:$0xff] }
 0x124   : > { %2064 = vmatpush1.bf16.msra.mxu1 %v2063_v7  ;;  %2194 = vmatprep.subr.bf16.mxu0 %v2193_v13  ;;  %v2209_v7 = vpack.c.bf16 %v1150_v62, %v1148_v61  ;;  %v2083_v13 = vpack.c.bf16 %v1021_v5, %v1019_v4  ;;  %v2211_v15 = vpack.c.bf16 %v1149_v8, %v1147_v6  ;;  %v1036_v5 = vld [vmem:[#allocation2 + $0x1e8] sm:$0xff]  ;;  %v1038_v6 = vld [vmem:[#allocation2 + $0x1f8] sm:$0xff]  ;;  %v1035_v8 = vld [vmem:[#allocation2 + $0x1e0] sm:$0xff] }
 0x125   : > { %2066 = vmatprep.subr.bf16.mxu1 %v2065_v9  ;;  %v1024_v9 = vld [vmem:[#allocation2 + $0x188] sm:$0xff] }
 0x126   : > { %v2085_v17 = vpack.c.bf16 %v1026_v10, %v1024_v9  ;;  %v1037_v9 = vld [vmem:[#allocation2 + $0x1f0] sm:$0xff]  ;;  %v1164_v10 = vld [vmem:[#allocation2 + $0x5e8] sm:$0xff] }
 0x127   : > { %2196 = vmatpush1.bf16.msra.mxu0 %v2195_v24  ;;  %v1153_v24 = vld [vmem:[#allocation2 + $0x590] sm:$0xff] }
 0x128   : > { %2068 = vmatpush1.bf16.msra.mxu1 %v2067_v23  ;;  %2198 = vmatprep.subr.bf16.mxu0 %v2197_v31  ;;  %v1151_v23 = vld [vmem:[#allocation2 + $0x580] sm:$0xff]  ;;  %v1030_v31 = vld [vmem:[#allocation2 + $0x1b8] sm:$0xff] }
 0x129   : > { %2070 = vmatprep.subr.bf16.mxu1 %v2069_v26  ;;  %v2087_v26 = vpack.c.bf16 %v1025_v20, %v1023_v18  ;;  %v2215_v28 = vpack.c.bf16 %v1153_v24, %v1151_v23  ;;  %v2089_v35 = vpack.c.bf16 %v1030_v31, %v1028_v30  ;;  %v1165_v18 = vld [vmem:[#allocation2 + $0x5f0] sm:$0xff]  ;;  %v2099_v24 = vpack.c.bf16 %v1037_v9, %v1035_v8 }
 0x12b   : > { %2200 = vmatpush1.bf16.msra.mxu0 %v2199_v40  ;;  %v2091_v40 = vpack.c.bf16 %v1029_v37, %v1027_v36  ;;  %v1040_v37 = vld [vmem:[#allocation2 + $0x208] sm:$0xff] }
 0x12c   : > { %2072 = vmatpush1.bf16.msra.mxu1 %v2071_v39  ;;  %2202 = vmatprep.subr.bf16.mxu0 %v2201_v45 }
 0x12d   : > { %2074 = vmatprep.subr.bf16.mxu1 %v2073_v41  ;;  %v1158_v41 = vld [vmem:[#allocation2 + $0x5b8] sm:$0xff] }
 0x12e   : > { %v2217_v44 = vpack.c.bf16 %v1158_v41, %v1156_v38  ;;  %v924_v38 = vld [vmem:[%s3077_s3] sm:$0xff] }
 0x12f   : > { %2204 = vmatpush1.bf16.msra.mxu0 %v2203_v52  ;;  %v1033_v52 = vld [vmem:[#allocation2 + $0x1d0] sm:$0xff]  ;;  %vm925_vm3 = vcmp.gt.f32.partialorder %v924_v38, 0.5 }
 0x130   : > { %2076 = vmatpush1.bf16.msra.mxu1 %v2075_v51  ;;  %2206 = vmatprep.subr.bf16.mxu0 %v2205_v57  ;;  %v1031_v51 = vld [vmem:[#allocation2 + $0x1c0] sm:$0xff]  ;;  %v2744_v49 = vsel %vm925_vm3, 1, %v2484_v1  ;;  %vm1753_vm3 = vcmask 64512  }
 0x131   : > { %2078 = vmatprep.subr.bf16.mxu1 %v2077_v53  ;;  %v1160_v53 = vld [vmem:[#allocation2 + $0x5c8] sm:$0xff]  ;;  %v2095_v55 = vpack.c.bf16 %v1033_v52, %v1031_v51  ;;  %v1159_v57 = vld [vmem:[#allocation2 + $0x5c0] sm:$0xff] }
 0x132   : > { %v2221_v62 = vpack.c.bf16 %v1162_v56, %v1160_v53 }
 0x133   : > { %2208 = vmatpush1.bf16.msra.mxu0 %v2207_v2 }
 0x134   : > { %2080 = vmatpush1.bf16.msra.mxu1 %v2079_v63  ;;  %2210 = vmatprep.subr.bf16.mxu0 %v2209_v7  ;;  %v2223_v63 = vpack.c.bf16 %v1161_v58, %v1159_v57  ;;  %v2097_v7 = vpack.c.bf16 %v1038_v6, %v1036_v5  ;;  %v2788_v5 = vld [vmem:[#allocation2 + $0x610] sm:$0xff] }
 0x135   : > { %2082 = vmatprep.subr.bf16.mxu1 %v2081_v3 }
 0x137   : > { %2212 = vmatpush1.bf16.msra.mxu0 %v2211_v15  ;;  %v1166_v15 = vld [vmem:[#allocation2 + $0x5f8] sm:$0xff] }
 0x138   : > { %2084 = vmatpush1.bf16.msra.mxu1 %v2083_v13  ;;  %2214 = vmatprep.subr.bf16.mxu0 %v2213_v22  ;;  %v2225_v30 = vpack.c.bf16 %v1166_v15, %v1164_v10 }
 0x139   : > { %2086 = vmatprep.subr.bf16.mxu1 %v2085_v17  ;;  %v1163_v17 = vld [vmem:[#allocation2 + $0x5e0] sm:$0xff] }
 0x13a   : > { %v2227_v31 = vpack.c.bf16 %v1165_v18, %v1163_v17  ;;  %v2814_v18 = vld [vmem:[#allocation2 + $0x228] sm:$0xff] }
 0x13b   : > { %2216 = vmatpush1.bf16.msra.mxu0 %v2215_v28 }
 0x13c   : > { %2088 = vmatpush1.bf16.msra.mxu1 %v2087_v26  ;;  %2218 = vmatprep.subr.bf16.mxu0 %v2217_v44  ;;  %v2229_v44 = vpack.c.bf16 %v1170_v43, %v1168_v42 }
 0x13d   : > { %2090 = vmatprep.subr.bf16.mxu1 %v2089_v35 }
 0x13f   : > { %2220 = vmatpush1.bf16.msra.mxu0 %v2219_v47 }
 0x140   : > { %2092 = vmatpush1.bf16.msra.mxu1 %v2091_v40  ;;  %2222 = vmatprep.subr.bf16.mxu0 %v2221_v62 }
 0x141   : > { %2094 = vmatprep.subr.bf16.mxu1 %v2093_v50 }
 0x143   : > { %2224 = vmatpush1.bf16.msra.mxu0 %v2223_v63 }
 0x144   : > { %2096 = vmatpush1.bf16.msra.mxu1 %v2095_v55  ;;  %2226 = vmatprep.subr.bf16.mxu0 %v2225_v30  ;;  %v2820_v30 = vld [vmem:[#allocation2 + $0x238] sm:$0xff] }
 0x145   : > { %2098 = vmatprep.subr.bf16.mxu1 %v2097_v7 }
 0x147   : > { %2228 = vmatpush1.bf16.msra.mxu0 %v2227_v31  ;;  %v2822_v31 = vld [vmem:[#allocation2 + $0x220] sm:$0xff] }
 0x148   : > { %2100 = vmatpush1.bf16.msra.mxu1 %v2099_v24  ;;  %2230 = vmatprep.subr.bf16.mxu0 %v2229_v44  ;;  %v2105_v44 = vpack.c.bf16 %v2820_v30, %v2814_v18 }
 0x182   : > { %v2362_v39 = vpop.permute.xlu0 %2361 }
 0x183   : > { %v2364_v45 = vunpack.i.h.bf16 %v2362_v39  ;;  %v2363_v46 = vunpack.i.l.bf16 %v2362_v39 }
 0x185   : > { %v847_v2 = vsel %vm841_vm2, %v2363_v46, %v2364_v45 }
 0x186   : > { %v2684_v54 = vpop.permute.xlu0 %2376  ;;  %v2703_v20 = vmax.f32 %v2641_v16, %v847_v2 }
 0x187   : > { %v2379_v59 = vunpack.i.h.bf16 %v2684_v54  ;;  %v2378_v60 = vunpack.i.l.bf16 %v2684_v54  ;;  %v2688_v61 = vpop.permute.xlu1 %2366 }
 0x188   : > { %v2369_v3 = vunpack.i.h.bf16 %v2688_v61  ;;  %v2368_v4 = vunpack.i.l.bf16 %v2688_v61 }
 0x189   : > { %v848_v11 = vsel %vm841_vm2, %v2378_v60, %v2363_v46 }
 0x18a   : > { %v844_v12 = vsel %vm841_vm2, %v2379_v59, %v2369_v3  ;;  %v846_v13 = vsel %vm841_vm2, %v2364_v45, %v2368_v4  ;;  %v2709_v35 = vmax.f32 %v2639_v14, %v848_v11 }
 0x18b   : > { %v2706_v22 = vmax.f32 %v2650_v19, %v846_v13  ;;  %v2372_v23 = vpop.permute.xlu1 %2371  ;;  %v2712_v36 = vmax.f32 %v2658_v25, %v844_v12  ;;  %v1042_v19 = vld [vmem:[#allocation2 + $0x218] sm:$0xff] }
 0x18c   : > { %v2374_v26 = vunpack.i.h.bf16 %v2372_v23  ;;  %v2373_v28 = vunpack.i.l.bf16 %v2372_v23  ;;  %v2101_v40 = vpack.c.bf16 %v1042_v19, %v1040_v37 }
 0x18d   : > { %v2380_v16 = vpack.i.bf16 %v2706_v22, %v2703_v20 }
 0x18e   : > { %v842_v39 = vsel %vm841_vm2, %v2373_v28, %v2374_v26  ;;  %v843_v14 = vsel %vm841_vm2, %v2369_v3, %v2373_v28  ;;  %2102 = vmatprep.subr.bf16.mxu1 %v2101_v40  ;;  %v849_v46 = vsel %vm841_vm2, %v2374_v26, %v2378_v60  ;;  %v2779_v60 = vld [vmem:[#allocation2 + $0x210] sm:$0xff] }
 0x18f   : > { %v2724_v25 = vmax.f32 %v2661_v27, %v843_v14  ;;  %v2727_v41 = vmax.f32 %v2669_v32, %v842_v39  ;;  %2381 = vrot.lane.b32.xlu1 %v2380_v16, %s2486_s27  ;;  %2386 = vrot.lane.b32.xlu0 %v2380_v16, %s2487_s28  ;;  %v2390_v27 = vpack.i.bf16 %v2712_v36, %v2709_v35  ;;  %v2735_v32 = vshrl.u32 %v839_v29, 7 }
 0x190   : > { %v845_v29 = vsel %vm841_vm2, %v2368_v4, %v2379_v59  ;;  %v2751_v50 = vmax.f32 %v2672_v34, %v849_v46  ;;  %v2777_v59 = vld [vmem:[#allocation2 + $0x200] sm:$0xff] }
 0x191   : > { %v2395_v45 = vpack.i.bf16 %v2727_v41, %v2724_v25  ;;  %v937_v47 = vsub.s32 2, %v2735_v32  ;;  %v953_v48 = vsub.s32 6, %v2735_v32  ;;  %v2760_v53 = vmax.f32 %v2652_v21, %v845_v29  ;;  %v2786_v4 = vld [vmem:[#allocation2 + $0x600] sm:$0xff]  ;;  %v1172_v29 = vld [vmem:[#allocation2 + $0x628] sm:$0xff] }
 0x192   : > { %v933_v34 = vsub.s32 1, %v2735_v32  ;;  %v929_v55 = vsub.s32 0, %v2735_v32  ;;  %v949_v57 = vsub.s32 5, %v2735_v32  ;;  %v945_v61 = vsub.s32 4, %v2735_v32 }
 0x193   : > { %2396 = vrot.lane.b32.xlu0 %v2395_v45, %s2486_s27  ;;  %2391 = vrot.lane.b32.xlu1 %v2390_v27, %s2486_s27  ;;  %v2754_v51 = vrot.slane %v2744_v49, %v937_v47  ;;  %v2757_v52 = vrot.slane %v2744_v49, %v953_v48  ;;  %v2415_v54 = vpack.i.bf16 %v2751_v50, %v2760_v53  ;;  %v941_v37 = vsub.s32 3, %v2735_v32 }
 0x194   : > { %v934_v56 = vrot.slane %v2744_v49, %v933_v34  ;;  %v2793_v6 = vrot.slane %v2744_v49, %v929_v55  ;;  %v2103_v8 = vpack.c.bf16 %v2779_v60, %v2777_v59  ;;  %v950_v9 = vrot.slane %v2744_v49, %v949_v57  ;;  %v1052_v60 = vld [vmem:[#allocation2 + $0x268] sm:$0xff] }
 0x195   : > { %v946_v15 = vrot.slane %v2744_v49, %v945_v61  ;;  %v2231_v17 = vpack.c.bf16 %v2788_v5, %v2786_v4  ;;  %v957_v19 = vsub.s32 7, %v2735_v32  ;;  %vm961_vm12 = vcmp.eq.s32.totalorder %v2754_v51, 1  ;;  %v1053_v5 = vld [vmem:[#allocation2 + $0x270] sm:$0xff]  ;;  %v1179_v51 = vld [vmem:[#allocation2 + $0x660] sm:$0xff] }
 0x196   : > { %vm960_vm6 = vcmp.eq.s32.totalorder %v934_v56, 1  ;;  %vm959_vm7 = vcmp.eq.s32.totalorder %v2793_v6, 1  ;;  %vm964_vm8 = vcmp.eq.s32.totalorder %v950_v9, 1  ;;  %vm965_vm13 = vcmp.eq.s32.totalorder %v2757_v52, 1 }
 0x197   : > { %2406 = vrot.lane.b32.xlu0 %v2390_v27, %s2487_s28  ;;  %2401 = vrot.lane.b32.xlu1 %v2395_v45, %s2487_s28  ;;  %vm963_vm9 = vcmp.eq.s32.totalorder %v946_v15, 1 }
 0x19b   : > { %2416 = vrot.lane.b32.xlu0 %v2415_v54, %s2487_s28  ;;  %2411 = vrot.lane.b32.xlu1 %v2415_v54, %s2486_s27  ;;  %v1174_v54 = vld [vmem:[#allocation2 + $0x638] sm:$0xff]  ;;  %s478_s28 = scalar_lea.vmem %s3087_s13, %s1973_s21 }
 0x201   : > { %v2772_v21 = vpop.permute.xlu1 %2381  ;;  %v2775_v58 = vpop.permute.xlu0 %2386 }
 0x202   : > { %v2384_v62 = vunpack.i.h.bf16 %v2772_v21  ;;  %v2383_v63 = vunpack.i.l.bf16 %v2772_v21  ;;  %v2389_v2 = vunpack.i.h.bf16 %v2775_v58  ;;  %v2388_v3 = vunpack.i.l.bf16 %v2775_v58  ;;  %v1049_v21 = vld [vmem:[#allocation2 + $0x250] sm:$0xff] }
 0x204   : > { %v880_v7 = vsel %vm874_vm4, %v2383_v63, %v2384_v62  ;;  %v913_v10 = vsel %vm907_vm5, %v2388_v3, %v2389_v2 }
 0x205   : > { %v2806_v11 = vpop.permute.xlu0 %2396  ;;  %v2808_v12 = vpop.permute.xlu1 %2391  ;;  %v884_v13 = vmax.f32 %v2703_v20, %v880_v7  ;;  %v2824_v20 = vld [vmem:[#allocation2 + $0x230] sm:$0xff] }
 0x206   : > { %v2399_v23 = vunpack.i.h.bf16 %v2806_v11  ;;  %v2398_v24 = vunpack.i.l.bf16 %v2806_v11  ;;  %v2394_v26 = vunpack.i.h.bf16 %v2808_v12  ;;  %v2393_v28 = vunpack.i.l.bf16 %v2808_v12  ;;  %v2856_v12 = vld [vmem:[#allocation2 + $0x620] sm:$0xff] }
 0x207   : > { %v917_v16 = vmax.f32 %v884_v13, %v913_v10  ;;  %v2107_v45 = vpack.c.bf16 %v2824_v20, %v2822_v31 }
 0x208   : > { %v877_v38 = vsel %vm874_vm4, %v2394_v26, %v2398_v24  ;;  %v881_v39 = vsel %vm874_vm4, %v2393_v28, %v2383_v63  ;;  %v876_v14 = vsel %vm874_vm4, %v2398_v24, %v2399_v23  ;;  %v2848_v63 = vrot.slane %v2744_v49, %v941_v37  ;;  %v1050_v37 = vld [vmem:[#allocation2 + $0x258] sm:$0xff] }
 0x209   : > { %v2835_v40 = vpop.permute.xlu0 %2406  ;;  %v2402_v42 = vpop.permute.xlu1 %2401  ;;  %v968_v43 = vsel %vm960_vm6, %v917_v16, %v884_v13  ;;  %v883_v57 = vmax.f32 %v2709_v35, %v881_v39  ;;  %v888_v56 = vmax.f32 %v2724_v25, %v876_v14  ;;  %v887_v61 = vmax.f32 %v2712_v36, %v877_v38  ;;  %v2858_v13 = vld [vmem:[#allocation2 + $0x630] sm:$0xff] }
 0x20a   : > { %v2409_v27 = vunpack.i.h.bf16 %v2835_v40  ;;  %v2408_v46 = vunpack.i.l.bf16 %v2835_v40  ;;  %v2404_v47 = vunpack.i.h.bf16 %v2402_v42  ;;  %v2403_v48 = vunpack.i.l.bf16 %v2402_v42  ;;  %1295 = vmatprep.mubr.f32.mxu1 %v968_v43 }
 0x20b   : > { %v2861_v35 = vrot.slane %v2744_v49, %v957_v19  ;;  %v2233_v16 = vpack.c.bf16 %v1174_v54, %v1172_v29  ;;  %v2235_v49 = vpack.c.bf16 %v2858_v13, %v2856_v12  ;;  %vm962_vm10 = vcmp.eq.s32.totalorder %v2848_v63, 1  ;;  %v1058_v63 = vld [vmem:[#allocation2 + $0x298] sm:$0xff] }
 0x20c   : > { %v914_v7 = vsel %vm907_vm5, %v2408_v46, %v2388_v3  ;;  %v910_v10 = vsel %vm907_vm5, %v2409_v27, %v2403_v48  ;;  %v909_v11 = vsel %vm907_vm5, %v2403_v48, %v2404_v47  ;;  %v1048_v3 = vld [vmem:[#allocation2 + $0x248] sm:$0xff] }
 0x20d   : > { %v916_v36 = vmax.f32 %v883_v57, %v914_v7  ;;  %v2417_v25 = vpop.permute.xlu0 %2416  ;;  %v2412_v18 = vpop.permute.xlu1 %2411  ;;  %v921_v24 = vmax.f32 %v888_v56, %v909_v11  ;;  %v920_v30 = vmax.f32 %v887_v61, %v910_v10  ;;  %v2109_v6 = vpack.c.bf16 %v1050_v37, %v1048_v3  ;;  %v1177_v7 = vld [vmem:[#allocation2 + $0x650] sm:$0xff]  ;;  %v1051_v10 = vld [vmem:[#allocation2 + $0x260] sm:$0xff]  ;;  %v1182_v11 = vld [vmem:[#allocation2 + $0x678] sm:$0xff] }
 0x20e   : > { %v2419_v38 = vunpack.i.h.bf16 %v2417_v25  ;;  %v2418_v39 = vunpack.i.l.bf16 %v2417_v25  ;;  %v2414_v14 = vunpack.i.h.bf16 %v2412_v18  ;;  %v2413_v40 = vunpack.i.l.bf16 %v2412_v18  ;;  %v1181_v18 = vld [vmem:[#allocation2 + $0x670] sm:$0xff]  ;;  %v1186_v3 = vld [vmem:[#allocation2 + $0x698] sm:$0xff]  ;;  %v1060_v37 = vld [vmem:[#allocation2 + $0x2a8] sm:$0xff] }
 0x20f   : > { %v967_v42 = vsel %vm959_vm7, %v916_v36, %v883_v57  ;;  %v972_v43 = vsel %vm964_vm8, %v921_v24, %v888_v56  ;;  %v971_v29 = vsel %vm963_vm9, %v920_v30, %v887_v61  ;;  %vm966_vm11 = vcmp.eq.s32.totalorder %v2861_v35, 1  ;;  %v1178_v57 = vld [vmem:[#allocation2 + $0x658] sm:$0xff]  ;;  %v1175_v61 = vld [vmem:[#allocation2 + $0x640] sm:$0xff]  ;;  %v1057_v30 = vld [vmem:[#allocation2 + $0x290] sm:$0xff] }
 0x210   : > { %v908_v19 = vsel %vm907_vm5, %v2404_v47, %v2419_v38  ;;  %v912_v48 = vsel %vm907_vm5, %v2389_v2, %v2418_v39  ;;  %1296 = vmatmul.mubr.f32.vlgmr.msra.gmra.mrb[8].mxu1 %v967_v42  ;;  %v875_v9 = vsel %vm874_vm4, %v2399_v23, %v2414_v14  ;;  %v878_v54 = vsel %vm874_vm4, %v2413_v40, %v2394_v26  ;;  %v1047_v2 = vld [vmem:[#allocation2 + $0x240] sm:$0xff]  ;;  %v1062_v35 = vld [vmem:[#allocation2 + $0x2b8] sm:$0xff]  ;;  %v1185_v42 = vld [vmem:[#allocation2 + $0x690] sm:$0xff] }
 0x211   : > { %v879_v47 = vsel %vm874_vm4, %v2384_v62, %v2413_v40  ;;  %v882_v58 = vsel %vm874_vm4, %v2414_v14, %v2393_v28  ;;  %2104 = vmatpush1.bf16.msra.mxu1 %v2103_v8  ;;  %v889_v15 = vmax.f32 %v2727_v41, %v875_v9  ;;  %1437 = vmatprep.mubr.f32.mxu0 %v972_v43  ;;  %v1176_v62 = vld [vmem:[#allocation2 + $0x648] sm:$0xff]  ;;  %v1054_v8 = vld [vmem:[#allocation2 + $0x278] sm:$0xff]  ;;  %v1055_v24 = vld [vmem:[#allocation2 + $0x280] sm:$0xff] }
 0x212   : > { %v885_v23 = vmax.f32 %v2706_v22, %v879_v47  ;;  %2106 = vmatprep.subr.bf16.mxu1 %v2105_v44  ;;  %v886_v26 = vmax.f32 %v2760_v53, %v878_v54  ;;  %v911_v28 = vsel %vm907_vm5, %v2418_v39, %v2409_v27  ;;  %1438 = vmatmul.mubr.f32.vlgmr.msra.gmra.mrb[0].mxu0 %v971_v29  ;;  %v1183_v40 = vld [vmem:[#allocation2 + $0x680] sm:$0xff]  ;;  %v1190_v29 = vld [vmem:[#allocation2 + $0x6b8] sm:$0xff] }
 0x213   : > { %v890_v59 = vmax.f32 %v2751_v50, %v882_v58  ;;  %v915_v22 = vsel %vm907_vm5, %v2419_v38, %v2408_v46  ;;  %2232 = vmatpush1.bf16.msra.mxu0 %v2231_v17  ;;  %v922_v44 = vmax.f32 %v889_v15, %v908_v19  ;;  %v2111_v27 = vpack.c.bf16 %v1049_v21, %v1047_v2  ;;  %v1180_v17 = vld [vmem:[#allocation2 + $0x668] sm:$0xff]  ;;  %v1059_v43 = vld [vmem:[#allocation2 + $0x2a0] sm:$0xff]  ;;  %v1061_v19 = vld [vmem:[#allocation2 + $0x2b0] sm:$0xff] }
 0x214   : > { %v919_v41 = vmax.f32 %v886_v26, %v911_v28  ;;  %v918_v53 = vmax.f32 %v885_v23, %v912_v48  ;;  %2234 = vmatprep.subr.bf16.mxu0 %v2233_v16  ;;  %v2237_v56 = vpack.c.bf16 %v1178_v57, %v1176_v62  ;;  %v2113_v4 = vpack.c.bf16 %v1054_v8, %v1052_v60  ;;  %v1184_v16 = vld [vmem:[#allocation2 + $0x688] sm:$0xff]  ;;  %v1066_v9 = vld [vmem:[#allocation2 + $0x2d8] sm:$0xff]  ;;  %v1187_v2 = vld [vmem:[#allocation2 + $0x6a0] sm:$0xff] }
 0x215   : > { %2108 = vmatpush1.bf16.msra.mxu1 %v2107_v45  ;;  %v923_v50 = vmax.f32 %v890_v59, %v915_v22  ;;  %v2914_v31 = vsel %vm965_vm13, %v922_v44, %v889_v15  ;;  %v1056_v45 = vld [vmem:[#allocation2 + $0x288] sm:$0xff]  ;;  %v2239_v13 = vpack.c.bf16 %v1177_v7, %v1175_v61  ;;  %v2115_v36 = vpack.c.bf16 %v1053_v5, %v1051_v10  ;;  %v1189_v15 = vld [vmem:[#allocation2 + $0x6b0] sm:$0xff]  ;;  %v1194_v57 = vld [vmem:[#allocation2 + $0x6d8] sm:$0xff] }
 0x216   : > { %v970_v46 = vsel %vm962_vm10, %v919_v41, %v886_v26  ;;  %2110 = vmatprep.subr.bf16.mxu1 %v2109_v6  ;;  %v2910_v12 = vsel %vm961_vm12, %v918_v53, %v885_v23  ;;  %v2241_v25 = vpack.c.bf16 %v1182_v11, %v1180_v17  ;;  %v2117_v52 = vpack.c.bf16 %v1058_v63, %v1056_v45  ;;  %v1188_v48 = vld [vmem:[#allocation2 + $0x6a8] sm:$0xff]  ;;  %v1063_v23 = vld [vmem:[#allocation2 + $0x2c0] sm:$0xff]  ;;  %v1065_v21 = vld [vmem:[#allocation2 + $0x2d0] sm:$0xff] }
 0x217   : > { %1366 = vmatprep.mubr.f32.mxu1 %v970_v46  ;;  %v974_v20 = vsel %vm966_vm11, %v923_v50, %v890_v59  ;;  %2236 = vmatpush1.bf16.msra.mxu0 %v2235_v49  ;;  %v2243_v38 = vpack.c.bf16 %v1181_v18, %v1179_v51  ;;  %v2119_v39 = vpack.c.bf16 %v1057_v30, %v1055_v24  ;;  %v1064_v6 = vld [vmem:[#allocation2 + $0x2c8] sm:$0xff]  ;;  %v1070_v59 = vld [vmem:[#allocation2 + $0x2f8] sm:$0xff]  ;;  %v1191_v41 = vld [vmem:[#allocation2 + $0x6c0] sm:$0xff] }
 0x218   : > { %1508 = vmatprep.mubr.f32.mxu0 %v974_v20  ;;  %2238 = vmatprep.subr.bf16.mxu0 %v2237_v56  ;;  %v2245_v14 = vpack.c.bf16 %v1186_v3, %v1184_v16  ;;  %v2121_v49 = vpack.c.bf16 %v1062_v35, %v1060_v37  ;;  %v2247_v54 = vpack.c.bf16 %v1185_v42, %v1183_v40  ;;  %v1192_v62 = vld [vmem:[#allocation2 + $0x6c8] sm:$0xff]  ;;  %v1193_v53 = vld [vmem:[#allocation2 + $0x6d0] sm:$0xff]  ;;  %v1067_v44 = vld [vmem:[#allocation2 + $0x2e0] sm:$0xff] }
 0x219   : > { %2112 = vmatpush1.bf16.msra.mxu1 %v2111_v27  ;;  %v2123_v47 = vpack.c.bf16 %v1061_v19, %v1059_v43  ;;  %v2249_v58 = vpack.c.bf16 %v1190_v29, %v1188_v48  ;;  %v2125_v26 = vpack.c.bf16 %v1066_v9, %v1064_v6  ;;  %v1068_v28 = vld [vmem:[#allocation2 + $0x2e8] sm:$0xff]  ;;  %v2251_v60 = vpack.c.bf16 %v1189_v15, %v1187_v2  ;;  %v1069_v27 = vld [vmem:[#allocation2 + $0x2f0] sm:$0xff]  ;;  %v1198_v61 = vld [vmem:[#allocation2 + $0x6f8] sm:$0xff] }
 0x21a   : > { %2114 = vmatprep.subr.bf16.mxu1 %v2113_v4  ;;  %v2127_v8 = vpack.c.bf16 %v1065_v21, %v1063_v23  ;;  %v2253_v22 = vpack.c.bf16 %v1194_v57, %v1192_v62  ;;  %v2129_v50 = vpack.c.bf16 %v1070_v59, %v1068_v28  ;;  %v1196_v56 = vld [vmem:[#allocation2 + $0x6e8] sm:$0xff]  ;;  %v1074_v10 = vld [vmem:[#allocation2 + $0x318] sm:$0xff]  ;;  %v2255_v46 = vpack.c.bf16 %v1193_v53, %v1191_v41  ;;  %v1195_v17 = vld [vmem:[#allocation2 + $0x6e0] sm:$0xff] }
 0x21b   : > { %2240 = vmatpush1.bf16.msra.mxu0 %v2239_v13  ;;  %v1072_v7 = vld [vmem:[#allocation2 + $0x308] sm:$0xff]  ;;  %v2131_v4 = vpack.c.bf16 %v1069_v27, %v1067_v44  ;;  %v2257_v5 = vpack.c.bf16 %v1198_v61, %v1196_v56  ;;  %v1197_v11 = vld [vmem:[#allocation2 + $0x6f0] sm:$0xff]  ;;  %v1071_v20 = vld [vmem:[#allocation2 + $0x300] sm:$0xff] }
 0x21c   : > { %2242 = vmatprep.subr.bf16.mxu0 %v2241_v25  ;;  %v2133_v45 = vpack.c.bf16 %v1074_v10, %v1072_v7  ;;  %v1073_v63 = vld [vmem:[#allocation2 + $0x310] sm:$0xff]  ;;  %v1200_v13 = vld [vmem:[#allocation2 + $0x708] sm:$0xff]  ;;  %v1078_v51 = vld [vmem:[#allocation2 + $0x338] sm:$0xff]  ;;  %v2259_v18 = vpack.c.bf16 %v1197_v11, %v1195_v17 }
 0x21d   : > { %2116 = vmatpush1.bf16.msra.mxu1 %v2115_v36  ;;  %v1202_v36 = vld [vmem:[#allocation2 + $0x718] sm:$0xff]  ;;  %v1076_v25 = vld [vmem:[#allocation2 + $0x328] sm:$0xff]  ;;  %v2135_v24 = vpack.c.bf16 %v1073_v63, %v1071_v20  ;;  %v1199_v30 = vld [vmem:[#allocation2 + $0x700] sm:$0xff] }
 0x21e   : > { %2118 = vmatprep.subr.bf16.mxu1 %v2117_v52  ;;  %v2261_v52 = vpack.c.bf16 %v1202_v36, %v1200_v13  ;;  %v1201_v16 = vld [vmem:[#allocation2 + $0x710] sm:$0xff]  ;;  %v1075_v3 = vld [vmem:[#allocation2 + $0x320] sm:$0xff]  ;;  %v2137_v37 = vpack.c.bf16 %v1078_v51, %v1076_v25  ;;  %v1082_v40 = vld [vmem:[#allocation2 + $0x358] sm:$0xff] }
 0x21f   : > { %2244 = vmatpush1.bf16.msra.mxu0 %v2243_v38  ;;  %v1077_v35 = vld [vmem:[#allocation2 + $0x330] sm:$0xff]  ;;  %v1204_v38 = vld [vmem:[#allocation2 + $0x728] sm:$0xff]  ;;  %v2263_v42 = vpack.c.bf16 %v1201_v16, %v1199_v30  ;;  %v1203_v19 = vld [vmem:[#allocation2 + $0x720] sm:$0xff] }
 0x220   : > { %2246 = vmatprep.subr.bf16.mxu0 %v2245_v14  ;;  %v1080_v14 = vld [vmem:[#allocation2 + $0x348] sm:$0xff]  ;;  %v2139_v43 = vpack.c.bf16 %v1077_v35, %v1075_v3  ;;  %v1205_v48 = vld [vmem:[#allocation2 + $0x730] sm:$0xff]  ;;  %v1079_v29 = vld [vmem:[#allocation2 + $0x340] sm:$0xff] }
 0x221   : > { %2120 = vmatpush1.bf16.msra.mxu1 %v2119_v39  ;;  %v1206_v39 = vld [vmem:[#allocation2 + $0x738] sm:$0xff]  ;;  %v2141_v6 = vpack.c.bf16 %v1082_v40, %v1080_v14  ;;  %v1081_v9 = vld [vmem:[#allocation2 + $0x350] sm:$0xff]  ;;  %v2267_v15 = vpack.c.bf16 %v1205_v48, %v1203_v19  ;;  %v1207_v21 = vld [vmem:[#allocation2 + $0x740] sm:$0xff] }
 0x222   : > { %2122 = vmatprep.subr.bf16.mxu1 %v2121_v49  ;;  %v2265_v49 = vpack.c.bf16 %v1206_v39, %v1204_v38  ;;  %v1086_v2 = vld [vmem:[#allocation2 + $0x378] sm:$0xff]  ;;  %v2143_v23 = vpack.c.bf16 %v1081_v9, %v1079_v29  ;;  %v1209_v62 = vld [vmem:[#allocation2 + $0x750] sm:$0xff]  ;;  %v1083_v57 = vld [vmem:[#allocation2 + $0x360] sm:$0xff] }
 0x223   : > { %2248 = vmatpush1.bf16.msra.mxu0 %v2247_v54  ;;  %v1208_v54 = vld [vmem:[#allocation2 + $0x748] sm:$0xff]  ;;  %v1085_v59 = vld [vmem:[#allocation2 + $0x370] sm:$0xff]  ;;  %v1090_v41 = vld [vmem:[#allocation2 + $0x398] sm:$0xff]  ;;  %v2271_v53 = vpack.c.bf16 %v1209_v62, %v1207_v21 }
 0x224   : > { %2250 = vmatprep.subr.bf16.mxu0 %v2249_v58  ;;  %v1084_v58 = vld [vmem:[#allocation2 + $0x368] sm:$0xff]  ;;  %v2147_v44 = vpack.c.bf16 %v1085_v59, %v1083_v57  ;;  %v1211_v27 = vld [vmem:[#allocation2 + $0x760] sm:$0xff]  ;;  %v1213_v56 = vld [vmem:[#allocation2 + $0x770] sm:$0xff] }
 0x225   : > { %2124 = vmatpush1.bf16.msra.mxu1 %v2123_v47  ;;  %v1210_v47 = vld [vmem:[#allocation2 + $0x758] sm:$0xff]  ;;  %v2145_v28 = vpack.c.bf16 %v1086_v2, %v1084_v58  ;;  %v1087_v61 = vld [vmem:[#allocation2 + $0x380] sm:$0xff]  ;;  %v1089_v10 = vld [vmem:[#allocation2 + $0x390] sm:$0xff]  ;;  %v2275_v11 = vpack.c.bf16 %v1213_v56, %v1211_v27 }
 0x226   : > { %2126 = vmatprep.subr.bf16.mxu1 %v2125_v26  ;;  %v2269_v26 = vpack.c.bf16 %v1210_v47, %v1208_v54  ;;  %v1094_v17 = vld [vmem:[#allocation2 + $0x3b8] sm:$0xff]  ;;  %v2151_v20 = vpack.c.bf16 %v1089_v10, %v1087_v61  ;;  %v1215_v63 = vld [vmem:[#allocation2 + $0x780] sm:$0xff]  ;;  %v1217_v13 = vld [vmem:[#allocation2 + $0x790] sm:$0xff] }
 0x227   : > { %2252 = vmatpush1.bf16.msra.mxu0 %v2251_v60  ;;  %v1212_v60 = vld [vmem:[#allocation2 + $0x768] sm:$0xff]  ;;  %v1091_v36 = vld [vmem:[#allocation2 + $0x3a0] sm:$0xff]  ;;  %v1093_v51 = vld [vmem:[#allocation2 + $0x3b0] sm:$0xff]  ;;  %v2279_v16 = vpack.c.bf16 %v1217_v13, %v1215_v63 }
 0x228   : > { %2254 = vmatprep.subr.bf16.mxu0 %v2253_v22  ;;  %v1088_v22 = vld [vmem:[#allocation2 + $0x388] sm:$0xff]  ;;  %v1098_v30 = vld [vmem:[#allocation2 + $0x3d8] sm:$0xff]  ;;  %v2155_v3 = vpack.c.bf16 %v1093_v51, %v1091_v36  ;;  %v1219_v35 = vld [vmem:[#allocation2 + $0x7a0] sm:$0xff] }
 0x229   : > { %2128 = vmatpush1.bf16.msra.mxu1 %v2127_v8  ;;  %v1214_v8 = vld [vmem:[#allocation2 + $0x778] sm:$0xff]  ;;  %v2149_v7 = vpack.c.bf16 %v1090_v41, %v1088_v22  ;;  %v1221_v38 = vld [vmem:[#allocation2 + $0x7b0] sm:$0xff]  ;;  %v1095_v39 = vld [vmem:[#allocation2 + $0x3c0] sm:$0xff] }
 0x22a   : > { %2130 = vmatprep.subr.bf16.mxu1 %v2129_v50  ;;  %v2273_v50 = vpack.c.bf16 %v1214_v8, %v1212_v60  ;;  %v1097_v40 = vld [vmem:[#allocation2 + $0x3d0] sm:$0xff]  ;;  %v1102_v19 = vld [vmem:[#allocation2 + $0x3f8] sm:$0xff]  ;;  %v2283_v48 = vpack.c.bf16 %v1221_v38, %v1219_v35  ;;  %v1223_v9 = vld [vmem:[#allocation2 + $0x7c0] sm:$0xff] }
 0x22b   : > { %2256 = vmatpush1.bf16.msra.mxu0 %v2255_v46  ;;  %v1216_v46 = vld [vmem:[#allocation2 + $0x788] sm:$0xff]  ;;  %v2159_v29 = vpack.c.bf16 %v1097_v40, %v1095_v39  ;;  %v1225_v54 = vld [vmem:[#allocation2 + $0x7d0] sm:$0xff]  ;;  %v1099_v47 = vld [vmem:[#allocation2 + $0x3e0] sm:$0xff] }
 0x22c   : > { %2258 = vmatprep.subr.bf16.mxu0 %v2257_v5  ;;  %v1092_v5 = vld [vmem:[#allocation2 + $0x3a8] sm:$0xff]  ;;  %v1101_v2 = vld [vmem:[#allocation2 + $0x3f0] sm:$0xff]  ;;  %v1227_v57 = vld [vmem:[#allocation2 + $0x7e0] sm:$0xff] }
 0x22d   : > { %2132 = vmatpush1.bf16.msra.mxu1 %v2131_v4  ;;  %v1218_v4 = vld [vmem:[#allocation2 + $0x798] sm:$0xff]  ;;  %v2153_v25 = vpack.c.bf16 %v1094_v17, %v1092_v5  ;;  %v2163_v21 = vpack.c.bf16 %v1101_v2, %v1099_v47  ;;  %v1516_v60 = vld [vmem:[%s3080_s6] sm:$0xff]  ;;  %v1646_v36 = vld [vmem:[%s3082_s8 + $0x10] sm:$0xff] }
 0x22e   : > { %2134 = vmatprep.subr.bf16.mxu1 %v2133_v45  ;;  %v2277_v45 = vpack.c.bf16 %v1218_v4, %v1216_v46  ;;  %1519 = vperm.xlu1 %2420, %v1516_v60   ;;  %v1660_v46 = vld [vmem:[%s3082_s8 + $0x80] sm:$0xff]  ;;  %v1661_v4 = vld [vmem:[%s3082_s8 + $0x88] sm:$0xff]  ;;  %v1650_v39 = vld [vmem:[%s3082_s8 + $0x30] sm:$0xff] }
 0x22f   : > { %2260 = vmatpush1.bf16.msra.mxu0 %v2259_v18  ;;  %v1220_v18 = vld [vmem:[#allocation2 + $0x7a8] sm:$0xff]  ;;  %v1644_v5 = vld [vmem:[%s3082_s8] sm:$0xff]  ;;  %v2293_v17 = vpack.c.bf16 %v1661_v4, %v1660_v46  ;;  %v1654_v47 = vld [vmem:[%s3082_s8 + $0x50] sm:$0xff] }
 0x230   : > { %2262 = vmatprep.subr.bf16.mxu0 %v2261_v52  ;;  %v1096_v52 = vld [vmem:[#allocation2 + $0x3c8] sm:$0xff]  ;;  %v1664_v51 = vld [vmem:[%s3082_s8 + $0xa0] sm:$0xff] }
 0x231   : > { %2136 = vmatpush1.bf16.msra.mxu1 %v2135_v24  ;;  %v1222_v24 = vld [vmem:[#allocation2 + $0x7b8] sm:$0xff]  ;;  %v2157_v14 = vpack.c.bf16 %v1098_v30, %v1096_v52  ;;  %v1648_v30 = vld [vmem:[%s3082_s8 + $0x20] sm:$0xff] }
 0x232   : > { %2138 = vmatprep.subr.bf16.mxu1 %v2137_v37  ;;  %v2281_v37 = vpack.c.bf16 %v1222_v24, %v1220_v18  ;;  %v1665_v18 = vld [vmem:[%s3082_s8 + $0xa8] sm:$0xff]  ;;  %v1668_v40 = vld [vmem:[%s3082_s8 + $0xc0] sm:$0xff] }
 0x233   : > { %2264 = vmatpush1.bf16.msra.mxu0 %v2263_v42  ;;  %v1224_v42 = vld [vmem:[#allocation2 + $0x7c8] sm:$0xff]  ;;  %v2301_v52 = vpack.c.bf16 %v1665_v18, %v1664_v51  ;;  %v1747_v46 = vld [vmem:[%s3084_s10] sm:$0xff] }
 0x234   : > { %2266 = vmatprep.subr.bf16.mxu0 %v2265_v49  ;;  %v1100_v49 = vld [vmem:[#allocation2 + $0x3e8] sm:$0xff]  ;;  %v1629_v4 = vld [vmem:[%s3081_s7] sm:$0x3] }
 0x235   : > { %2140 = vmatpush1.bf16.msra.mxu1 %v2139_v43  ;;  %v1226_v43 = vld [vmem:[#allocation2 + $0x7d8] sm:$0xff]  ;;  %v2161_v58 = vpack.c.bf16 %v1102_v19, %v1100_v49  ;;  %v1652_v19 = vld [vmem:[%s3082_s8 + $0x40] sm:$0xff]  ;;  %vm1630_vm14 = vcmp.gt.f32.partialorder %v1629_v4, 0.5 }
 0x236   : > { %2142 = vmatprep.subr.bf16.mxu1 %v2141_v6  ;;  %v2285_v6 = vpack.c.bf16 %v1226_v43, %v1224_v42  ;;  %v1669_v42 = vld [vmem:[%s3082_s8 + $0xc8] sm:$0xff] }
 0x237   : > { %2268 = vmatpush1.bf16.msra.mxu0 %v2267_v15  ;;  %v1228_v15 = vld [vmem:[#allocation2 + $0x7e8] sm:$0xff]  ;;  %v2309_v49 = vpack.c.bf16 %v1669_v42, %v1668_v40 }
 0x238   : > { %2270 = vmatprep.subr.bf16.mxu0 %v2269_v26  ;;  %v2287_v26 = vpack.c.bf16 %v1225_v54, %v1223_v9 }
 0x239   : > { %2144 = vmatpush1.bf16.msra.mxu1 %v2143_v23  ;;  %v1230_v23 = vld [vmem:[#allocation2 + $0x7f8] sm:$0xff] }
 0x23a   : > { %2146 = vmatprep.subr.bf16.mxu1 %v2145_v28  ;;  %v2289_v62 = vpack.c.bf16 %v1230_v23, %v1228_v15  ;;  %v1229_v28 = vld [vmem:[#allocation2 + $0x7f0] sm:$0xff]  ;;  %v1672_v15 = vld [vmem:[%s3082_s8 + $0xe0] sm:$0xff]  ;;  %v1673_v23 = vld [vmem:[%s3082_s8 + $0xe8] sm:$0xff] }
 0x23b   : > { %2272 = vmatpush1.bf16.msra.mxu0 %v2271_v53  ;;  %v2291_v59 = vpack.c.bf16 %v1229_v28, %v1227_v57  ;;  %v1674_v28 = vld [vmem:[%s3082_s8 + $0xf0] sm:$0xff] }
 0x23c   : > { %2274 = vmatprep.subr.bf16.mxu0 %v2273_v50 }
 0x23d   : > { %2148 = vmatpush1.bf16.msra.mxu1 %v2147_v44 }
 0x23e   : > { %2150 = vmatprep.subr.bf16.mxu1 %v2149_v7 }
 0x23f   : > { %2276 = vmatpush1.bf16.msra.mxu0 %v2275_v11  ;;  %v1645_v11 = vld [vmem:[%s3082_s8 + $0x8] sm:$0xff] }
 0x240   : > { %2278 = vmatprep.subr.bf16.mxu0 %v2277_v45  ;;  %v1663_v45 = vld [vmem:[%s3082_s8 + $0x98] sm:$0xff]  ;;  %v2295_v63 = vpack.c.bf16 %v1645_v11, %v1644_v5  ;;  %v1631_v5 = vsel %vm1630_vm14, 1, %v2484_v1 }
 0x241   : > { %2152 = vmatpush1.bf16.msra.mxu1 %v2151_v20  ;;  %v1662_v20 = vld [vmem:[%s3082_s8 + $0x90] sm:$0xff]  ;;  %v1635_v11 = vrot.slane %v1631_v5, %v929_v55 }
 0x242   : > { %2154 = vmatprep.subr.bf16.mxu1 %v2153_v25  ;;  %v2297_v13 = vpack.c.bf16 %v1663_v45, %v1662_v20  ;;  %v1647_v25 = vld [vmem:[%s3082_s8 + $0x18] sm:$0xff] }
 0x243   : > { %2280 = vmatpush1.bf16.msra.mxu0 %v2279_v16  ;;  %v2299_v24 = vpack.c.bf16 %v1647_v25, %v1646_v36  ;;  %v1649_v16 = vld [vmem:[%s3082_s8 + $0x28] sm:$0xff] }
 0x244   : > { %2282 = vmatprep.subr.bf16.mxu0 %v2281_v37  ;;  %v1667_v37 = vld [vmem:[%s3082_s8 + $0xb8] sm:$0xff]  ;;  %v2303_v35 = vpack.c.bf16 %v1649_v16, %v1648_v30 }
 0x245   : > { %2156 = vmatpush1.bf16.msra.mxu1 %v2155_v3  ;;  %v1666_v3 = vld [vmem:[%s3082_s8 + $0xb0] sm:$0xff] }
 0x246   : > { %2158 = vmatprep.subr.bf16.mxu1 %v2157_v14  ;;  %v2305_v38 = vpack.c.bf16 %v1667_v37, %v1666_v3  ;;  %v1651_v14 = vld [vmem:[%s3082_s8 + $0x38] sm:$0xff] }
 0x247   : > { %2284 = vmatpush1.bf16.msra.mxu0 %v2283_v48  ;;  %v2307_v43 = vpack.c.bf16 %v1651_v14, %v1650_v39  ;;  %v1653_v48 = vld [vmem:[%s3082_s8 + $0x48] sm:$0xff] }
 0x248   : > { %2286 = vmatprep.subr.bf16.mxu0 %v2285_v6  ;;  %v1671_v6 = vld [vmem:[%s3082_s8 + $0xd8] sm:$0xff]  ;;  %v2311_v9 = vpack.c.bf16 %v1653_v48, %v1652_v19 }
 0x249   : > { %2160 = vmatpush1.bf16.msra.mxu1 %v2159_v29  ;;  %v1670_v29 = vld [vmem:[%s3082_s8 + $0xd0] sm:$0xff] }
 0x24a   : > { %2162 = vmatprep.subr.bf16.mxu1 %v2161_v58  ;;  %v2313_v54 = vpack.c.bf16 %v1671_v6, %v1670_v29  ;;  %v1655_v58 = vld [vmem:[%s3082_s8 + $0x58] sm:$0xff] }
 0x24b   : > { %2288 = vmatpush1.bf16.msra.mxu0 %v2287_v26  ;;  %v2315_v2 = vpack.c.bf16 %v1655_v58, %v1654_v47  ;;  %v2317_v26 = vpack.c.bf16 %v1673_v23, %v1672_v15 }
 0x24c   : > { %2290 = vmatprep.subr.bf16.mxu0 %v2289_v62  ;;  %v1657_v62 = vld [vmem:[%s3082_s8 + $0x68] sm:$0xff] }
 0x24d   : > { %2164 = vmatpush1.bf16.msra.mxu1 %v2163_v21  ;;  %v1656_v21 = vld [vmem:[%s3082_s8 + $0x60] sm:$0xff] }
 0x24e   : > { %v2319_v57 = vpack.c.bf16 %v1657_v62, %v1656_v21 }
 0x24f   : > { %2292 = vmatpush1.bf16.msra.mxu0 %v2291_v59  ;;  %v1675_v59 = vld [vmem:[%s3082_s8 + $0xf8] sm:$0xff] }
 0x250   : > { %1367 = vmatmul.mubr.f32.vlgmr.msra.gmra.mrb[8].mxu1 %v2910_v12  ;;  %v1515_v12 = vld [vmem:[%s3079_s5] sm:$0xff]  ;;  %2294 = vmatprep.subr.bf16.mxu0 %v2293_v17  ;;  %v2321_v60 = vpack.c.bf16 %v1675_v59, %v1674_v28  ;;  %v1639_v17 = vrot.slane %v1631_v5, %v933_v34 }
 0x251   : > { %1595 = vmatprep.mubr.f32.mxu1 %v2483_v0 }
 0x252   : > { %1509 = vmatmul.mubr.f32.vlgmr.msra.gmra.mrb[0].mxu0 %v2914_v31 }
 0x253   : > { %2296 = vmatpush3.bf16.msra.mxu0 %v2295_v63 }
 0x254   : > { %2298 = vmatprep.subr.bf16.mxu0 %v2297_v13 }
 0x257   : > { %2300 = vmatpush3.bf16.msra.mxu0 %v2299_v24 }
 0x258   : > { %2302 = vmatprep.subr.bf16.mxu0 %v2301_v52 }
 0x25b   : > { %2304 = vmatpush3.bf16.msra.mxu0 %v2303_v35 }
 0x25c   : > { %2306 = vmatprep.subr.bf16.mxu0 %v2305_v38 }
 0x25f   : > { %2308 = vmatpush3.bf16.msra.mxu0 %v2307_v43 }
 0x260   : > { %2310 = vmatprep.subr.bf16.mxu0 %v2309_v49 }
 0x263   : > { %2312 = vmatpush3.bf16.msra.mxu0 %v2311_v9 }
 0x264   : > { %2314 = vmatprep.subr.bf16.mxu0 %v2313_v54 }
 0x267   : > { %2316 = vmatpush3.bf16.msra.mxu0 %v2315_v2 }
 0x268   : > { %2318 = vmatprep.subr.bf16.mxu0 %v2317_v26 }
 0x26b   : > { %2320 = vmatpush3.bf16.msra.mxu0 %v2319_v57 }
 0x26c   : > { %2322 = vmatprep.subr.bf16.mxu0 %v2321_v60 }
 0x2ad   : > { %v1520_v31 = vpop.permute.xlu1 %1519 }
 0x323   : > { %v1368_v8 = vpop.f32.mrb[8].mxu1 }
 0x324   : > { %v1370_v22 = vpop.f32.mrb[9].mxu1 }
 0x325   : > { %v1510_v41 = vpop.f32.mrb[0].mxu0 }
 0x326   : > { %v2325_v53 = vadd.f32 %v1510_v41, %v1368_v8  ;;  %v1512_v44 = vpop.f32.mrb[1].mxu0  ;;  %v1658_v8 = vld [vmem:[%s3082_s8 + $0x70] sm:$0xff] }
 0x327   : > { %v2326_v50 = vadd.f32 %v1512_v44, %v1370_v22  ;;  %v1659_v22 = vld [vmem:[%s3082_s8 + $0x78] sm:$0xff] }
 0x328   : > { %v2323_v41 = vpack.c.bf16 %v1659_v22, %v1658_v8 }
 0x329   : > { %1986 = vmatprep.subr.msk.mxu1 %vm502_vm0, %v2326_v50 }
 0x32a   : > { %1987 = vmatpush1.msk.msra.mxu1 %vm502_vm0, %v2325_v53  ;;  %2324 = vmatpush3.bf16.msra.mxu0 %v2323_v41  ;;  %vm1641_vm0 = vcmp.eq.s32.totalorder %v1639_v17, 1 }
 0x32b   : > { %1988 = vmatmul.mubr.msk.f32.vlgmr.msra.gmra.mrb[10].mxu1 %vm498_vm1, %v1515_v12  ;;  %2032 = vmatprep.subr.mxu1 %v2483_v0  ;;  %vm1640_vm1 = vcmp.eq.s32.totalorder %v1635_v11, 1 }
 0x3fe   : > { %v1597_v27 = vpop.f32.mrb[10].mxu1 }
 0x3ff   : > { %v2935_v56 = vadd.f32 %v1597_v27, %v1520_v31  ;;  %v1599_v61 = vpop.f32.mrb[11].mxu1 }
 0x400   : > { %v2937_v7 = vadd.f32 %v1599_v61, %v1520_v31 }
 0x401   : > { %1602 = vst [vmem:[%s474_s19] sm:$0xff] %v2935_v56 }
 0x402   : > { %1603 = vst [vmem:[%s474_s19 + $0x8] sm:$0xff] %v2937_v7  ;;  %v2421_v10 = vpack.i.bf16 %v2937_v7, %v2935_v56 }
 0x404   : > { %2422 = vrot.lane.b32.xlu0 %v2421_v10, %s2485_s22 }
 0x476   : > { %v2423_v53 = vpop.permute.xlu0 %2422 }
 0x477   : > { %v2425_v44 = vunpack.i.h.bf16 %v2423_v53  ;;  %v2424_v50 = vunpack.i.l.bf16 %v2423_v53 }
 0x479   : > { %v1608_v12 = vsel %vm841_vm2, %v2424_v50, %v2425_v44  ;;  %v1609_v31 = vsel %vm841_vm2, %v2425_v44, %v2424_v50  ;;  %vm2489_vm2 = vmmov 0  }
 0x47a   : > { %v1610_v27 = vmax.f32 %v2935_v56, %v1608_v12  ;;  %v1611_v61 = vmax.f32 %v2937_v7, %v1609_v31  ;;  %2034 = vmatprep.mubr.msk.f32.mxu1 %vm2489_vm2, %v2483_v0 }
 0x47c   : > { %v2431_v10 = vpack.i.bf16 %v1611_v61, %v1610_v27 }
 0x47e   : > { %2432 = vrot.lane.b32.xlu0 %v2431_v10, %s2486_s27  ;;  %2427 = vrot.lane.b32.xlu1 %v2431_v10, %s2488_s15 }
 0x482   : > { %1750 = vperm.xlu1 %2420, %v1747_v46  }
 0x4f0   : > { %v2433_v56 = vpop.permute.xlu0 %2432  ;;  %v2428_v7 = vpop.permute.xlu1 %2427 }
 0x4f1   : > { %v2435_v20 = vunpack.i.h.bf16 %v2433_v56  ;;  %v2434_v45 = vunpack.i.l.bf16 %v2433_v56  ;;  %v2430_v63 = vunpack.i.h.bf16 %v2428_v7  ;;  %v2429_v13 = vunpack.i.l.bf16 %v2428_v7 }
 0x4f3   : > { %v1617_v36 = vsel %vm1616_vm15, %v2429_v13, %v2430_v63  ;;  %v1618_v25 = vsel %vm1616_vm15, %v2430_v63, %v2429_v13  ;;  %v1625_v1 = vsel %vm874_vm4, %v2434_v45, %v2435_v20  ;;  %v1626_v24 = vsel %vm874_vm4, %v2435_v20, %v2434_v45 }
 0x4f4   : > { %v1619_v51 = vmax.f32 %v1610_v27, %v1617_v36  ;;  %v1620_v18 = vmax.f32 %v1611_v61, %v1618_v25  ;;  %vm1827_vm4 = vcmask 523264  }
 0x4f6   : > { %v1628_v34 = vmax.f32 %v1620_v18, %v1626_v24  ;;  %v1627_v32 = vmax.f32 %v1619_v51, %v1625_v1 }
 0x4f8   : > { %v1643_v55 = vsel %vm1641_vm0, %v1628_v34, %v1620_v18  ;;  %v1642_v52 = vsel %vm1640_vm1, %v1627_v32, %v1619_v51 }
 0x4f9   : > { %1740 = vmatprep.mubr.f32.mxu0 %v1643_v55 }
 0x4fa   : > { %1741 = vmatmul.mubr.f32.vlgmr.msra.gmra.mrb[2].mxu0 %v1642_v52 }
 0x501   : > { %v1751_v37 = vpop.permute.xlu1 %1750 }
 0x5cd   : > { %v2027_v30 = vpop.f32.mrb[2].mxu0 }
 0x5ce   : > { %v2028_v16 = vpop.f32.mrb[3].mxu0 }
 0x5cf   : > { %v2029_v3 = vadd.f32 %v2028_v16, %v2027_v30 }
 0x5d1   : > { %2033 = vmatpush3.msra.mxu1 %v2029_v3 }
 0x5d2   : > { %2035 = vmatmul.mubr.msk.f32.vlgmr.msra.gmra.mrb[12].mxu1 %vm1753_vm3, %v1746_v33 }
 0x6a5   : > { %v1823_v35 = vpop.f32.mrb[12].mxu1 }
 0x6a6   : > { %v1824_v38 = vadd.f32 %v1823_v35, %v1751_v37  ;;  %v2036_v0 = vpop.f32.mrb[13].mxu1 }
 0x6a8   : > { %1828 = vst.msk [vmem:[%s478_s28] sm:$0xff] %vm1827_vm4, %v1824_v38 }
 0x6a9 PF: > { %s25_s25 = sadd.s32 1, %s2478_s25  }
 0x6aa   : > { %p22_p3 = scmp.ge.s32.totalorder %s25_s25, 4  }
 0x6ac   :  { %24 = sbr.rel (!%p22_p3) target bundleno = 1 (0x1), region = 123 }
 0x6b3   :  { %1880 = vsyncpa [#allocation3], 1 }
 0x6b4   :  { %1882 = vsyncpa [#allocation3 + $0x1], 1 }

</bundles_post_ra>
